<compile_context>
chip_gen: v7x
topology: tpu7x:2x2x1
jax: 0.10.0
libtpu: 0.0.40
codegen_flags: <defaults>
</compile_context>

<pallas_src>
import functools

import numpy as np
import jax
import jax.numpy as jnp
from jax.experimental import pallas as pl
from jax.experimental.pallas import tpu as pltpu

F_PAD = 128      # lane-dense feature width (all real feature dims <= 128)
TILE_M = 128     # node-row tile for the A_hat @ H matmul
B_PAD = 8        # sublane-aligned padding for the graph-batch axis


# ------------------------------ Pallas kernel -------------------------------

def _gcn_forward_kernel(a_ref,       # (TILE_M, N_pad) bf16   row slab of A_hat
                        x_ref,       # (N_pad, F)     bf16    raw node features
                        w_in_ref,    # (F, F)         bf16    input_proj W^T
                        b_in_ref,    # (1, F)         f32
                        w_conv_ref,  # (1, F, F)      bf16    conv W (BN folded), per layer
                        b_conv_ref,  # (1, 1, F)      f32     conv bias (BN folded)
                        p_ref,       # (B_PAD, N_pad) bf16    mean-pool matrix
                        w_fc_ref,    # (3, F, F)      bf16    fc1/fc2/fc3 (BN folded)
                        b_fc_ref,    # (3, 1, F)      f32
                        o_ref,       # (B_PAD, F)     f32
                        x_scr,       # VMEM (N_pad, F) f32    current node features
                        h_scr):      # VMEM (N_pad, F) bf16   H = X @ W for this layer
    layer = pl.program_id(0)
    tile = pl.program_id(1)
    last_layer = pl.num_programs(0) - 1
    last_tile = pl.num_programs(1) - 1
    tile_m = a_ref.shape[0]

    # ---- per-layer prologue: runs once per layer, before any of its tiles ---
    @pl.when(tile == 0)
    def _prologue():
        @pl.when(layer == 0)
        def _input_proj():
            x0 = jnp.dot(x_ref[...], w_in_ref[...],
                         preferred_element_type=jnp.float32)
            x_scr[...] = jnp.maximum(x0 + b_in_ref[...], 0.0)

        # feature transform H = X @ W_eff, computed ONCE per layer for all
        # nodes; kept bf16 in VMEM for the tiled A_hat @ H below.
        h = jnp.dot(x_scr[...].astype(jnp.bfloat16), w_conv_ref[0],
                    preferred_element_type=jnp.float32)
        h_scr[...] = h.astype(jnp.bfloat16)

    # ---- message passing for this node-row tile: A_hat[tile] @ H ------------
    msg = jnp.dot(a_ref[...], h_scr[...], preferred_element_type=jnp.float32)
    y = jnp.maximum(msg + b_conv_ref[0], 0.0)      # bias + BN folded, then ReLU
    row0 = pl.multiple_of(tile * tile_m, tile_m)
    x_scr[pl.ds(row0, tile_m), :] = y              # dropout = identity (eval)

    # ---- epilogue: mean-pool + FC head, fused on the final grid step --------
    @pl.when(jnp.logical_and(layer == last_layer, tile == last_tile))
    def _head():
        pooled = jnp.dot(p_ref[...], x_scr[...].astype(jnp.bfloat16),
                         preferred_element_type=jnp.float32)
        h1 = jnp.maximum(
            jnp.dot(pooled.astype(jnp.bfloat16), w_fc_ref[0],
                    preferred_element_type=jnp.float32) + b_fc_ref[0], 0.0)
        h2 = jnp.maximum(
            jnp.dot(h1.astype(jnp.bfloat16), w_fc_ref[1],
                    preferred_element_type=jnp.float32) + b_fc_ref[1], 0.0)
        o_ref[...] = (jnp.dot(h2.astype(jnp.bfloat16), w_fc_ref[2],
                              preferred_element_type=jnp.float32)
                      + b_fc_ref[2])


@functools.partial(jax.jit, static_argnames=("n_pad", "num_layers"))
def _fused_forward(a, x, w_in, b_in, w_conv, b_conv, p, w_fc, b_fc,
                   *, n_pad, num_layers):
    num_tiles = n_pad // TILE_M
    full2 = lambda l, i: (0, 0)
    full3 = lambda l, i: (0, 0, 0)

    return pl.pallas_call(
        _gcn_forward_kernel,
        out_shape=jax.ShapeDtypeStruct((B_PAD, F_PAD), jnp.float32),
        grid_spec=pltpu.PrefetchScalarGridSpec(
            num_scalar_prefetch=0,
            grid=(num_layers, num_tiles),
            in_specs=[
                pl.BlockSpec((TILE_M, n_pad), lambda l, i: (i, 0)),       # A_hat slab
                pl.BlockSpec((n_pad, F_PAD), full2),                      # node feats
                pl.BlockSpec((F_PAD, F_PAD), full2),                      # input_proj W^T
                pl.BlockSpec((1, F_PAD), full2),                          # input_proj b
                pl.BlockSpec((1, F_PAD, F_PAD), lambda l, i: (l, 0, 0)),  # conv W (layer l)
                pl.BlockSpec((1, 1, F_PAD), lambda l, i: (l, 0, 0)),      # conv b (layer l)
                pl.BlockSpec((B_PAD, n_pad), full2),                      # pool matrix
                pl.BlockSpec((3, F_PAD, F_PAD), full3),                   # fc weights
                pl.BlockSpec((3, 1, F_PAD), full3),                       # fc biases
            ],
            out_specs=pl.BlockSpec((B_PAD, F_PAD), full2),
            scratch_shapes=[
                pltpu.VMEM((n_pad, F_PAD), jnp.float32),   # node features X_l
                pltpu.VMEM((n_pad, F_PAD), jnp.bfloat16),  # H = X_l @ W_l
            ],
        ),
        compiler_params=pltpu.CompilerParams(
            dimension_semantics=("arbitrary", "arbitrary"),
            vmem_limit_bytes=32 * 1024 * 1024,
        ),
    )(a, x, w_in, b_in, w_conv, b_conv, p, w_fc, b_fc)


# -------------------------- operand prep (trace time) ------------------------

def _pad2(a, rows, cols):
    a = jnp.asarray(a, jnp.float32)
    return jnp.zeros((rows, cols), jnp.float32).at[:a.shape[0], :a.shape[1]].set(a)


def _fold_bn(w, b, gamma, beta, eps=1e-5, mean=0.0, var=1.0):
    # eval-mode BatchNorm folded into the preceding linear:
    #   y = ((x @ W^T + b) - mean) * gamma/sqrt(var+eps) + beta
    s = gamma / jnp.sqrt(var + eps)
    w_eff = w.T * s[None, :]                 # [in, out], scale per output col
    b_eff = (b - mean) * s + beta
    return w_eff, b_eff


def prepare_operands(params, x, a_hat, pool_mat, eps=1e-5):
    n = x.shape[0]
    b_graphs = pool_mat.shape[0]
    n_pad = max(TILE_M, ((n + TILE_M - 1) // TILE_M) * TILE_M)

    ops = {"n_pad": n_pad, "num_layers": len(params["convs"]),
           "b_graphs": b_graphs}
    ops["x"] = _pad2(x, n_pad, F_PAD).astype(jnp.bfloat16)
    ops["a"] = _pad2(a_hat, n_pad, n_pad).astype(jnp.bfloat16)
    ops["p"] = _pad2(pool_mat, B_PAD, n_pad).astype(jnp.bfloat16)

    w_in, b_in = params["input_proj"]
    ops["w_in"] = _pad2(w_in.T, F_PAD, F_PAD).astype(jnp.bfloat16)
    ops["b_in"] = _pad2(b_in[None, :], 1, F_PAD)

    w_convs, b_convs = [], []
    for (wc, bc), (gamma, beta) in zip(params["convs"], params["bns"]):
        w_eff, b_eff = _fold_bn(wc, bc, gamma, beta, eps)
        w_convs.append(_pad2(w_eff, F_PAD, F_PAD))
        b_convs.append(_pad2(b_eff[None, :], 1, F_PAD))
    ops["w_conv"] = jnp.stack(w_convs).astype(jnp.bfloat16)   # (L, 128, 128)
    ops["b_conv"] = jnp.stack(b_convs)                        # (L, 1, 128) f32

    w1, b1 = params["fc1"]; g1, be1 = params["bn_fc1"]
    w2, b2 = params["fc2"]; g2, be2 = params["bn_fc2"]
    w3, b3 = params["fc3"]
    w1e, b1e = _fold_bn(w1, b1, g1, be1, eps)
    w2e, b2e = _fold_bn(w2, b2, g2, be2, eps)
    ops["w_fc"] = jnp.stack([_pad2(w1e, F_PAD, F_PAD),
                             _pad2(w2e, F_PAD, F_PAD),
                             _pad2(w3.T, F_PAD, F_PAD)]).astype(jnp.bfloat16)
    ops["b_fc"] = jnp.stack([_pad2(b1e[None, :], 1, F_PAD),
                             _pad2(b2e[None, :], 1, F_PAD),
                             _pad2(b3[None, :], 1, F_PAD)])
    return ops


def gcn_model_forward(params, x, a_hat, pool_mat):
    ops = prepare_operands(params, x, a_hat, pool_mat)
    out = _fused_forward(ops["a"], ops["x"], ops["w_in"], ops["b_in"],
                         ops["w_conv"], ops["b_conv"], ops["p"],
                         ops["w_fc"], ops["b_fc"],
                         n_pad=ops["n_pad"], num_layers=ops["num_layers"])
    return out[:ops["b_graphs"], 0]          # real graphs, real scalar column


# ----------------------------- parameter setup ------------------------------

def init_params(key, in_c, hid, out_c, num_layers=2):
    def linear(k, fan_in, fan_out):
        k1, k2 = jax.random.split(k)
        bound = 1.0 / jnp.sqrt(jnp.float32(fan_in))
        w = jax.random.uniform(k1, (fan_out, fan_in), jnp.float32, -bound, bound)
        b = jax.random.uniform(k2, (fan_out,), jnp.float32, -bound, bound)
        return w, b

    def bn(k, f):
        k1, k2 = jax.random.split(k)
        gamma = 1.0 + 0.1 * jax.random.normal(k1, (f,), jnp.float32)
        beta = 0.1 * jax.random.normal(k2, (f,), jnp.float32)
        return gamma, beta

    keys = jax.random.split(key, 16)
    params = {"input_proj": linear(keys[0], in_c, hid), "convs": [], "bns": []}
    conv_dims = [(hid, hid)] * (num_layers - 1) + [(hid, out_c)]
    for i, (fi, fo) in enumerate(conv_dims):
        params["convs"].append(linear(keys[1 + i], fi, fo))
        params["bns"].append(bn(keys[5 + i], fo))
    params["fc1"] = linear(keys[10], out_c, hid)
    params["fc2"] = linear(keys[11], hid, hid // 2)
    params["fc3"] = linear(keys[12], hid // 2, 1)
    params["bn_fc1"] = bn(keys[13], hid)
    params["bn_fc2"] = bn(keys[14], hid // 2)
    return params


# ------------------------------ graph utilities ------------------------------

def build_gcn_adjacency(edge_index, num_nodes):
    """Dense A_hat = D^-1/2 (A + I) D^-1/2 matching PyG GCNConv normalization.
    Self-loop weight is clamped to 1 even if edge_index already contains
    self-loops; duplicate edges are deduped (unweighted adjacency)."""
    src, dst = edge_index[0], edge_index[1]
    a = jnp.zeros((num_nodes, num_nodes), jnp.float32)
    a = a.at[dst, src].set(1.0)                          # message flow src -> dst
    a = jnp.maximum(a, jnp.eye(num_nodes, dtype=jnp.float32))   # add self-loops once
    deg = a.sum(axis=1)
    d_inv_sqrt = 1.0 / jnp.sqrt(jnp.maximum(deg, 1e-12))
    return d_inv_sqrt[:, None] * a * d_inv_sqrt[None, :]


def build_pool_matrix(batch, num_graphs):
    """P[g, n] = 1/|graph g| if node n belongs to graph g (global_mean_pool)."""
    counts = jnp.zeros((num_graphs,), jnp.float32).at[batch].add(1.0)
    onehot = (batch[None, :] == jnp.arange(num_graphs)[:, None]).astype(jnp.float32)
    return onehot / jnp.maximum(counts[:, None], 1.0)


# ----------------------- pure numpy reference (same math) --------------------

def _reference_forward(ops, num_layers, b_graphs):
    bf = lambda v: np.asarray(jnp.asarray(v, jnp.bfloat16)).astype(np.float32)
    f32 = lambda v: np.asarray(jnp.asarray(v, jnp.float32))
    a, x = f32(ops["a"]), f32(ops["x"])
    w_in, b_in = f32(ops["w_in"]), f32(ops["b_in"])
    w_conv, b_conv = f32(ops["w_conv"]), f32(ops["b_conv"])
    p, w_fc, b_fc = f32(ops["p"]), f32(ops["w_fc"]), f32(ops["b_fc"])

    h = np.maximum(x @ w_in + b_in, 0.0)
    for l in range(num_layers):
        ht = bf(bf(h) @ w_conv[l])
        h = np.maximum(a @ ht + b_conv[l], 0.0)
    pooled = p @ bf(h)
    h1 = np.maximum(bf(pooled) @ w_fc[0] + b_fc[0], 0.0)
    h2 = np.maximum(bf(h1) @ w_fc[1] + b_fc[1], 0.0)
    out = bf(h2) @ w_fc[2] + b_fc[2]
    return out[:b_graphs, 0]


# ----------------------------------- main ------------------------------------

if __name__ == "__main__":
    key = jax.random.PRNGKey(0)
    k_feat, k_param = jax.random.split(key)

    N = 16            # nodes
    B = 2             # graphs in the batch
    IN_C = 16
    HID = 32
    OUT_C = 16
    NUM_LAYERS = 2

    x = jax.random.normal(k_feat, (N, IN_C), jnp.float32)

    # two small graphs (nodes 0..7 and 8..15), undirected chains + a shortcut
    src = jnp.array([0, 1, 2, 3, 4, 5, 6, 0, 8, 9, 10, 11, 12, 13, 14, 8],
                    dtype=jnp.int32)
    dst = jnp.array([1, 2, 3, 4, 5, 6, 7, 4, 9, 10, 11, 12, 13, 14, 15, 12],
                    dtype=jnp.int32)
    edge_index = jnp.stack([jnp.concatenate([src, dst]),
                            jnp.concatenate([dst, src])], axis=0)
    batch = jnp.concatenate([jnp.zeros(8, jnp.int32), jnp.ones(8, jnp.int32)])

    a_hat = build_gcn_adjacency(edge_index, N)
    pool_mat = build_pool_matrix(batch, B)
    params = init_params(k_param, IN_C, HID, OUT_C, num_layers=NUM_LAYERS)

    out = gcn_model_forward(params, x, a_hat, pool_mat)
    out = jax.block_until_ready(out)
    assert out.shape == (B,), out.shape

    # check against a pure-numpy forward on the SAME folded/padded operands
    ops = prepare_operands(params, x, a_hat, pool_mat)
    ref = _reference_forward(ops, NUM_LAYERS, B)
    assert np.allclose(np.asarray(out), ref, rtol=5e-3, atol=5e-3), (out, ref)

    print("KERNEL_OK")
</pallas_src>

<mosaic_0001>
module attributes {stable_mosaic.version = 11 : i64} {
  func.func @_gcn_forward_kernel(%arg0: i32, %arg1: i32, %arg2: memref<128x128xbf16, #tpu.memory_space<vmem>>, %arg3: memref<128x128xbf16, #tpu.memory_space<vmem>>, %arg4: memref<128x128xbf16, #tpu.memory_space<vmem>>, %arg5: memref<1x128xf32, #tpu.memory_space<vmem>>, %arg6: memref<1x128x128xbf16, #tpu.memory_space<vmem>>, %arg7: memref<1x1x128xf32, #tpu.memory_space<vmem>>, %arg8: memref<8x128xbf16, #tpu.memory_space<vmem>>, %arg9: memref<3x128x128xbf16, #tpu.memory_space<vmem>>, %arg10: memref<3x1x128xf32, #tpu.memory_space<vmem>>, %arg11: memref<8x128xf32, #tpu.memory_space<vmem>>, %arg12: memref<128x128xf32, #tpu.memory_space<vmem>>, %arg13: memref<128x128xbf16, #tpu.memory_space<vmem>>) attributes {dimension_semantics = [#tpu.dimension_semantics<arbitrary>, #tpu.dimension_semantics<arbitrary>], iteration_bounds = array<i64: 2, 1>, scalar_prefetch = 0 : i64, scratch_operands = 2 : i64, tpu.core_type = #tpu.core_type<tc>, window_params = [{transform_indices = @transform_0, window_bounds = array<i64: 128, 128>}, {pipeline_mode = #tpu.pipeline_mode<synchronous>, transform_indices = @transform_1, window_bounds = array<i64: 128, 128>}, {pipeline_mode = #tpu.pipeline_mode<synchronous>, transform_indices = @transform_2, window_bounds = array<i64: 128, 128>}, {pipeline_mode = #tpu.pipeline_mode<synchronous>, transform_indices = @transform_3, window_bounds = array<i64: 1, 128>}, {transform_indices = @transform_4, window_bounds = array<i64: 1, 128, 128>}, {transform_indices = @transform_5, window_bounds = array<i64: 1, 1, 128>}, {pipeline_mode = #tpu.pipeline_mode<synchronous>, transform_indices = @transform_6, window_bounds = array<i64: 8, 128>}, {pipeline_mode = #tpu.pipeline_mode<synchronous>, transform_indices = @transform_7, window_bounds = array<i64: 3, 128, 128>}, {pipeline_mode = #tpu.pipeline_mode<synchronous>, transform_indices = @transform_8, window_bounds = array<i64: 3, 1, 128>}, {pipeline_mode = #tpu.pipeline_mode<synchronous>, transform_indices = @transform_9, window_bounds = array<i64: 8, 128>}]} {
    %c0_i32 = arith.constant 0 : i32
    %0 = arith.cmpi eq, %arg1, %c0_i32 : i32
    %1 = arith.extui %0 : i1 to i32
    %c0_i32_0 = arith.constant 0 : i32
    %2 = arith.cmpi ne, %1, %c0_i32_0 : i32
    scf.if %2 {
      %c0_i32_11 = arith.constant 0 : i32
      %21 = arith.cmpi eq, %arg0, %c0_i32_11 : i32
      %22 = arith.extui %21 : i1 to i32
      %c0_i32_12 = arith.constant 0 : i32
      %23 = arith.cmpi ne, %22, %c0_i32_12 : i32
      scf.if %23 {
        %c0_21 = arith.constant 0 : index
        %c0_22 = arith.constant 0 : index
        %31 = vector.load %arg3[%c0_21, %c0_22] : memref<128x128xbf16, #tpu.memory_space<vmem>>, vector<128x128xbf16>
        %c0_23 = arith.constant 0 : index
        %c0_24 = arith.constant 0 : index
        %32 = vector.load %arg4[%c0_23, %c0_24] : memref<128x128xbf16, #tpu.memory_space<vmem>>, vector<128x128xbf16>
        %cst_25 = arith.constant dense<0.000000e+00> : vector<128x128xf32>
        %33 = tpu.matmul %31, %32, %cst_25 {dimension_numbers = #tpu.dot_dimension_numbers<[1], [0], [0], [1], [0, 0, 1, 1], [], []>} : vector<128x128xbf16>, vector<128x128xbf16>, vector<128x128xf32> -> vector<128x128xf32>
        %c0_26 = arith.constant 0 : index
        %c0_27 = arith.constant 0 : index
        %34 = vector.load %arg5[%c0_26, %c0_27] : memref<1x128xf32, #tpu.memory_space<vmem>>, vector<1x128xf32>
        %35 = vector.broadcast %34 : vector<1x128xf32> to vector<128x128xf32>
        %36 = arith.addf %33, %35 : vector<128x128xf32>
        %cst_28 = arith.constant 0.000000e+00 : f32
        %37 = vector.broadcast %cst_28 : f32 to vector<128x128xf32>
        %38 = arith.maximumf %36, %37 : vector<128x128xf32>
        %c0_29 = arith.constant 0 : index
        %c0_30 = arith.constant 0 : index
        %39 = vector.load %arg12[%c0_29, %c0_30] : memref<128x128xf32, #tpu.memory_space<vmem>>, vector<128x128xf32>
        tpu.vector_store %arg12[%c0_29, %c0_30], %38 {strides = array<i32>} : memref<128x128xf32, #tpu.memory_space<vmem>>, vector<128x128xf32>,
      } else {
      }
      %c0_13 = arith.constant 0 : index
      %c0_14 = arith.constant 0 : index
      %24 = vector.load %arg12[%c0_13, %c0_14] : memref<128x128xf32, #tpu.memory_space<vmem>>, vector<128x128xf32>
      %25 = arith.truncf %24 : vector<128x128xf32> to vector<128x128xbf16>
      %c0_15 = arith.constant 0 : index
      %c0_16 = arith.constant 0 : index
      %c0_17 = arith.constant 0 : index
      %26 = vector.load %arg6[%c0_15, %c0_16, %c0_17] : memref<1x128x128xbf16, #tpu.memory_space<vmem>>, vector<1x128x128xbf16>
      %27 = vector.shape_cast %26 : vector<1x128x128xbf16> to vector<128x128xbf16>
      %cst_18 = arith.constant dense<0.000000e+00> : vector<128x128xf32>
      %28 = tpu.matmul %25, %27, %cst_18 {dimension_numbers = #tpu.dot_dimension_numbers<[1], [0], [0], [1], [0, 0, 1, 1], [], []>} : vector<128x128xbf16>, vector<128x128xbf16>, vector<128x128xf32> -> vector<128x128xf32>
      %29 = arith.truncf %28 : vector<128x128xf32> to vector<128x128xbf16>
      %c0_19 = arith.constant 0 : index
      %c0_20 = arith.constant 0 : index
      %30 = vector.load %arg13[%c0_19, %c0_20] : memref<128x128xbf16, #tpu.memory_space<vmem>>, vector<128x128xbf16>
      tpu.vector_store %arg13[%c0_19, %c0_20], %29 {strides = array<i32>} : memref<128x128xbf16, #tpu.memory_space<vmem>>, vector<128x128xbf16>,
    } else {
    }
    %c0 = arith.constant 0 : index
    %c0_1 = arith.constant 0 : index
    %3 = vector.load %arg2[%c0, %c0_1] : memref<128x128xbf16, #tpu.memory_space<vmem>>, vector<128x128xbf16>
    %c0_2 = arith.constant 0 : index
    %c0_3 = arith.constant 0 : index
    %4 = vector.load %arg13[%c0_2, %c0_3] : memref<128x128xbf16, #tpu.memory_space<vmem>>, vector<128x128xbf16>
    %cst = arith.constant dense<0.000000e+00> : vector<128x128xf32>
    %5 = tpu.matmul %3, %4, %cst {dimension_numbers = #tpu.dot_dimension_numbers<[1], [0], [0], [1], [0, 0, 1, 1], [], []>} : vector<128x128xbf16>, vector<128x128xbf16>, vector<128x128xf32> -> vector<128x128xf32>
    %c0_4 = arith.constant 0 : index
    %c0_5 = arith.constant 0 : index
    %c0_6 = arith.constant 0 : index
    %6 = vector.load %arg7[%c0_4, %c0_5, %c0_6] : memref<1x1x128xf32, #tpu.memory_space<vmem>>, vector<1x1x128xf32>
    %7 = vector.shape_cast %6 : vector<1x1x128xf32> to vector<1x128xf32>
    %8 = vector.broadcast %7 : vector<1x128xf32> to vector<128x128xf32>
    %9 = arith.addf %5, %8 : vector<128x128xf32>
    %cst_7 = arith.constant 0.000000e+00 : f32
    %10 = vector.broadcast %cst_7 : f32 to vector<128x128xf32>
    %11 = arith.maximumf %9, %10 : vector<128x128xf32>
    %c128_i32 = arith.constant 128 : i32
    %12 = arith.muli %arg1, %c128_i32 : i32
    %13 = tpu.assume_multiple %12, 128 : i32
    %14 = arith.index_cast %13 : i32 to index
    %c0_8 = arith.constant 0 : index
    %15 = vector.load %arg12[%14, %c0_8] : memref<128x128xf32, #tpu.memory_space<vmem>>, vector<128x128xf32>
    tpu.vector_store %arg12[%14, %c0_8], %11 {strides = array<i32>} : memref<128x128xf32, #tpu.memory_space<vmem>>, vector<128x128xf32>,
    %c1_i32 = arith.constant 1 : i32
    %16 = arith.cmpi eq, %arg0, %c1_i32 : i32
    %c0_i32_9 = arith.constant 0 : i32
    %17 = arith.cmpi eq, %arg1, %c0_i32_9 : i32
    %18 = arith.andi %16, %17 : i1
    %19 = arith.extui %18 : i1 to i32
    %c0_i32_10 = arith.constant 0 : i32
    %20 = arith.cmpi ne, %19, %c0_i32_10 : i32
    scf.if %20 {
      %c0_11 = arith.constant 0 : index
      %c0_12 = arith.constant 0 : index
      %21 = vector.load %arg8[%c0_11, %c0_12] : memref<8x128xbf16, #tpu.memory_space<vmem>>, vector<8x128xbf16>
      %c0_13 = arith.constant 0 : index
      %c0_14 = arith.constant 0 : index
      %22 = vector.load %arg12[%c0_13, %c0_14] : memref<128x128xf32, #tpu.memory_space<vmem>>, vector<128x128xf32>
      %23 = arith.truncf %22 : vector<128x128xf32> to vector<128x128xbf16>
      %cst_15 = arith.constant dense<0.000000e+00> : vector<8x128xf32>
      %24 = tpu.matmul %21, %23, %cst_15 {dimension_numbers = #tpu.dot_dimension_numbers<[1], [0], [0], [1], [0, 0, 1, 1], [], []>} : vector<8x128xbf16>, vector<128x128xbf16>, vector<8x128xf32> -> vector<8x128xf32>
      %25 = arith.truncf %24 : vector<8x128xf32> to vector<8x128xbf16>
      %c0_16 = arith.constant 0 : index
      %c0_17 = arith.constant 0 : index
      %c0_18 = arith.constant 0 : index
      %26 = vector.load %arg9[%c0_16, %c0_17, %c0_18] : memref<3x128x128xbf16, #tpu.memory_space<vmem>>, vector<1x128x128xbf16>
      %27 = vector.shape_cast %26 : vector<1x128x128xbf16> to vector<128x128xbf16>
      %cst_19 = arith.constant dense<0.000000e+00> : vector<8x128xf32>
      %28 = tpu.matmul %25, %27, %cst_19 {dimension_numbers = #tpu.dot_dimension_numbers<[1], [0], [0], [1], [0, 0, 1, 1], [], []>} : vector<8x128xbf16>, vector<128x128xbf16>, vector<8x128xf32> -> vector<8x128xf32>
      %c0_20 = arith.constant 0 : index
      %c0_21 = arith.constant 0 : index
      %c0_22 = arith.constant 0 : index
      %29 = vector.load %arg10[%c0_20, %c0_21, %c0_22] : memref<3x1x128xf32, #tpu.memory_space<vmem>>, vector<1x1x128xf32>
      %30 = vector.shape_cast %29 : vector<1x1x128xf32> to vector<1x128xf32>
      %31 = vector.broadcast %30 : vector<1x128xf32> to vector<8x128xf32>
      %32 = arith.addf %28, %31 : vector<8x128xf32>
      %cst_23 = arith.constant 0.000000e+00 : f32
      %33 = vector.broadcast %cst_23 : f32 to vector<8x128xf32>
      %34 = arith.maximumf %32, %33 : vector<8x128xf32>
      %35 = arith.truncf %34 : vector<8x128xf32> to vector<8x128xbf16>
      %c1 = arith.constant 1 : index
      %c0_24 = arith.constant 0 : index
      %c0_25 = arith.constant 0 : index
      %36 = vector.load %arg9[%c1, %c0_24, %c0_25] : memref<3x128x128xbf16, #tpu.memory_space<vmem>>, vector<1x128x128xbf16>
      %37 = vector.shape_cast %36 : vector<1x128x128xbf16> to vector<128x128xbf16>
      %cst_26 = arith.constant dense<0.000000e+00> : vector<8x128xf32>
      %38 = tpu.matmul %35, %37, %cst_26 {dimension_numbers = #tpu.dot_dimension_numbers<[1], [0], [0], [1], [0, 0, 1, 1], [], []>} : vector<8x128xbf16>, vector<128x128xbf16>, vector<8x128xf32> -> vector<8x128xf32>
      %c1_27 = arith.constant 1 : index
      %c0_28 = arith.constant 0 : index
      %c0_29 = arith.constant 0 : index
      %39 = vector.load %arg10[%c1_27, %c0_28, %c0_29] : memref<3x1x128xf32, #tpu.memory_space<vmem>>, vector<1x1x128xf32>
      %40 = vector.shape_cast %39 : vector<1x1x128xf32> to vector<1x128xf32>
      %41 = vector.broadcast %40 : vector<1x128xf32> to vector<8x128xf32>
      %42 = arith.addf %38, %41 : vector<8x128xf32>
      %cst_30 = arith.constant 0.000000e+00 : f32
      %43 = vector.broadcast %cst_30 : f32 to vector<8x128xf32>
      %44 = arith.maximumf %42, %43 : vector<8x128xf32>
      %45 = arith.truncf %44 : vector<8x128xf32> to vector<8x128xbf16>
      %c2 = arith.constant 2 : index
      %c0_31 = arith.constant 0 : index
      %c0_32 = arith.constant 0 : index
      %46 = vector.load %arg9[%c2, %c0_31, %c0_32] : memref<3x128x128xbf16, #tpu.memory_space<vmem>>, vector<1x128x128xbf16>
      %47 = vector.shape_cast %46 : vector<1x128x128xbf16> to vector<128x128xbf16>
      %cst_33 = arith.constant dense<0.000000e+00> : vector<8x128xf32>
      %48 = tpu.matmul %45, %47, %cst_33 {dimension_numbers = #tpu.dot_dimension_numbers<[1], [0], [0], [1], [0, 0, 1, 1], [], []>} : vector<8x128xbf16>, vector<128x128xbf16>, vector<8x128xf32> -> vector<8x128xf32>
      %c2_34 = arith.constant 2 : index
      %c0_35 = arith.constant 0 : index
      %c0_36 = arith.constant 0 : index
      %49 = vector.load %arg10[%c2_34, %c0_35, %c0_36] : memref<3x1x128xf32, #tpu.memory_space<vmem>>, vector<1x1x128xf32>
      %50 = vector.shape_cast %49 : vector<1x1x128xf32> to vector<1x128xf32>
      %51 = vector.broadcast %50 : vector<1x128xf32> to vector<8x128xf32>
      %52 = arith.addf %48, %51 : vector<8x128xf32>
      %c0_37 = arith.constant 0 : index
      %c0_38 = arith.constant 0 : index
      %53 = vector.load %arg11[%c0_37, %c0_38] : memref<8x128xf32, #tpu.memory_space<vmem>>, vector<8x128xf32>
      tpu.vector_store %arg11[%c0_37, %c0_38], %52 {strides = array<i32>} : memref<8x128xf32, #tpu.memory_space<vmem>>, vector<8x128xf32>,
    } else {
    }
    return
  }
  func.func @transform_0(%arg0: i32, %arg1: i32) -> (i32, i32) {
    %c0_i32 = arith.constant 0 : i32
    %c0_i32_0 = arith.constant 0 : i32
    return %arg1, %c0_i32 : i32, i32
  }
  func.func @transform_1(%arg0: i32, %arg1: i32) -> (i32, i32) {
    %c0_i32 = arith.constant 0 : i32
    %c0_i32_0 = arith.constant 0 : i32
    %c0_i32_1 = arith.constant 0 : i32
    return %c0_i32, %c0_i32_0 : i32, i32
  }
  func.func @transform_2(%arg0: i32, %arg1: i32) -> (i32, i32) {
    %c0_i32 = arith.constant 0 : i32
    %c0_i32_0 = arith.constant 0 : i32
    %c0_i32_1 = arith.constant 0 : i32
    return %c0_i32, %c0_i32_0 : i32, i32
  }
  func.func @transform_3(%arg0: i32, %arg1: i32) -> (i32, i32) {
    %c0_i32 = arith.constant 0 : i32
    %c0_i32_0 = arith.constant 0 : i32
    %c0_i32_1 = arith.constant 0 : i32
    return %c0_i32, %c0_i32_0 : i32, i32
  }
  func.func @transform_4(%arg0: i32, %arg1: i32) -> (i32, i32, i32) {
    %c0_i32 = arith.constant 0 : i32
    %c0_i32_0 = arith.constant 0 : i32
    %c0_i32_1 = arith.constant 0 : i32
    return %arg0, %c0_i32, %c0_i32_0 : i32, i32, i32
  }
  func.func @transform_5(%arg0: i32, %arg1: i32) -> (i32, i32, i32) {
    %c0_i32 = arith.constant 0 : i32
    %c0_i32_0 = arith.constant 0 : i32
    %c0_i32_1 = arith.constant 0 : i32
    return %arg0, %c0_i32, %c0_i32_0 : i32, i32, i32
  }
  func.func @transform_6(%arg0: i32, %arg1: i32) -> (i32, i32) {
    %c0_i32 = arith.constant 0 : i32
    %c0_i32_0 = arith.constant 0 : i32
    %c0_i32_1 = arith.constant 0 : i32
    return %c0_i32, %c0_i32_0 : i32, i32
  }
  func.func @transform_7(%arg0: i32, %arg1: i32) -> (i32, i32, i32) {
    %c0_i32 = arith.constant 0 : i32
    %c0_i32_0 = arith.constant 0 : i32
    %c0_i32_1 = arith.constant 0 : i32
    %c0_i32_2 = arith.constant 0 : i32
    return %c0_i32, %c0_i32_0, %c0_i32_1 : i32, i32, i32
  }
  func.func @transform_8(%arg0: i32, %arg1: i32) -> (i32, i32, i32) {
    %c0_i32 = arith.constant 0 : i32
    %c0_i32_0 = arith.constant 0 : i32
    %c0_i32_1 = arith.constant 0 : i32
    %c0_i32_2 = arith.constant 0 : i32
    return %c0_i32, %c0_i32_0, %c0_i32_1 : i32, i32, i32
  }
  func.func @transform_9(%arg0: i32, %arg1: i32) -> (i32, i32) {
    %c0_i32 = arith.constant 0 : i32
    %c0_i32_0 = arith.constant 0 : i32
    %c0_i32_1 = arith.constant 0 : i32
    return %c0_i32, %c0_i32_0 : i32, i32
  }
}

</mosaic_0001>

<bundles_post_ra>
// kernel: _fused_forward.1
= control target key start
LH: loop header
LB: loop body
LE: loop exit
PB: predicated region body
PF: predicated region fallthrough
CT: control target
= control target key end

     0   :  { %s2830_s0 = inlined_call_operand.hbm [shape: bf16[128,128], index: 0, kind: input, shape index: {}]   ;;  %s2831_s1 = inlined_call_operand.hbm [shape: bf16[128,128], index: 1, kind: input, shape index: {}]   ;;  %s2832_s2 = inlined_call_operand.hbm [shape: bf16[128,128], index: 2, kind: input, shape index: {}]   ;;  %s2833_s3 = inlined_call_operand.vmem [shape: f32[1,128], index: 3, kind: input, shape index: {}]   ;;  %s2834_s4 = inlined_call_operand.hbm [shape: bf16[2,128,128], index: 4, kind: input, shape index: {}]   ;;  %s2835_s5 = inlined_call_operand.vmem [shape: f32[2,1,128], index: 5, kind: input, shape index: {}]   ;;  %s2836_s6 = inlined_call_operand.vmem [shape: bf16[8,128], index: 6, kind: input, shape index: {}]   ;;  %s2837_s7 = inlined_call_operand.hbm [shape: bf16[3,128,128], index: 7, kind: input, shape index: {}]   ;;  %s2838_s8 = inlined_call_operand.vmem [shape: f32[3,1,128], index: 8, kind: input, shape index: {}]   ;;  %s2839_s9 = inlined_call_operand.hbm [shape: f32[8,128], index: 9, kind: output, shape index: {}]  }
   0x1   :  { %2845 = sst [smem:[#allocation19_spill]] %s2831_s1 }
   0x2   :  { %2846 = sst [smem:[#allocation20_spill]] %s2838_s8 }
   0x3   :  { %2847 = sst [smem:[#allocation21_spill]] %s2839_s9 }
   0x4   :  { %14 = vsyncpa [#allocation5], 0 }
   0x5   :  { %15 = vsyncpa [#allocation8], 0 }
   0x6   :  { %16 = vsyncpa [#allocation11], 0 }
   0x7   :  { %18 = vsyncpa [#allocation11 + $0x1], 0 }
   0x8   :  { %19 = vsyncpa [#allocation6], 0  ;;  %s2470_s30 = smov 0   ;;  %s2472_s10 = smov 0  }
   0x9   :  { %s2474_s11 = smov 0   ;;  %s2476_s12 = smov 0  }
   0xa   :  { %s2478_s13 = smov 0   ;;  %s2480_s14 = smov 0  }
   0xb LB: > { %s2499_s15 = sadd.s32 4294967295, %s2408_s14   ;;  %p146_p0 = scmp.ne.s32.totalorder %s2392_s10, %s2388_s30  ;;  %s2408_s14 = sphi %s2480_s14, %s25_s14   ;;  %s2404_s13 = sphi %s2478_s13, %s2868_s13   ;;  %s2400_s12 = sphi %s2476_s12, %s2867_s12   ;;  %s2396_s11 = sphi %s2474_s11, %s2866_s11   ;;  %s2392_s10 = sphi %s2472_s10, %s2865_s10   ;;  %s2388_s30 = sphi %s2470_s30, %s2864_s30  }
   0xc   : > { %p2840_p1 = scmp.eq.s32.totalorder %s2499_s15, 0  ;;  %p1649_p2 = scmp.ge.s32.totalorder %s2408_s14, 1 }
   0xd   : > { %p267_p3 = scmp.lt.s32.totalorder %s2408_s14, 3  ;;  %s2410_s18 = smov [#allocation7]  }
   0xe   : > { %p2507_p4 = por %p2840_p1, %p146_p0  ;;  %s295_s19 = sshll.u32 %s2410_s18, 4  ;;  %s296_s19 = int_to_ptr.vmem [resolvable:$true] %s295_s19 }
   0xf   : > { %p2511_p5 = pnand %p1649_p2, %p267_p3  ;;  %s2411_s21 = smov [#allocation12]  }
  0x10   : > { %s2848_s16 = scalar_select %p2507_p4, 1, 0 }
  0x11   : > { %s2849_s17 = scalar_select %p2511_p5, 1, 0 }
  0x12   : > { %p2033_p6 = pneg %p2511_p5  ;;  %s327_s22 = sshll.u32 %s2411_s21, 4  ;;  %s2523_s22 = int_to_ptr.vmem [resolvable:$true] %s327_s22 }
  0x13   : > { %s2851_s1 = sld [smem:[#allocation19_spill]] }
  0x14   : > { %p2519_p7 = pnand %p2033_p6, %p2840_p1 }
  0x16   : > { %p2533_p9 = pneg %p2519_p7 }
  0x19   : > { %s2174_s25 = scalar_lea.hbm %s2851_s1, 1024 }
  0x1a   : > { %p2175_p8 = scmp.ne.s32.totalorder %s2851_s1, %s2174_s25  ;;  %p2181_p12 = scmp.lt.u32.totalorder %s2174_s25, %s2851_s1 }
  0x1c   : > { %p2177_p10 = pnand %p2533_p9, %p2175_p8 }
  0x1e   : > { %p2178_p11 = pneg %p2177_p10 }
  0x20   : > { %p2183_p13 = pnand %p2181_p12, %p2178_p11 }
  0x22   : > { %2186 = shalt.err (!%p2183_p13)
}
  0x23   : > { %s2187_s18 = scalar_lea.vmem %s296_s19, 1024  ;;  %p2195_p6 = scmp.lt.s32.totalorder %s296_s19, %s296_s19 }
  0x24   : > { %p2188_p0 = scmp.ne.s32.totalorder %s296_s19, %s2187_s18  ;;  %p2196_p1 = scmp.lt.s32.totalorder %s2187_s18, %s2187_s18 }
  0x26   : > { %p2190_p2 = pnand %p2188_p0, %p2533_p9  ;;  %p2197_p4 = por %p2196_p1, %p2195_p6 }
  0x28   : > { %p2191_p3 = pneg %p2190_p2 }
  0x2a   : > { %p2198_p5 = pnand %p2197_p4, %p2191_p3 }
  0x2c   : > { %2201 = shalt.err (!%p2198_p5)
}
  0x2d   : > { %s2412_s21 = smov 64   ;;  %s2413_s23 = smov 4  }
  0x2e   : > { %2039 = dma.hbm_to_vmem [thread:$0]  (!%p2519_p7), %s2851_s1, 1024, %s296_s19, [#allocation8], %s2412_s21, %s2412_s21, %s2413_s23  }
  0x2f   : > { %s2202_s29 = scalar_lea.hbm %s2837_s7, 3072 }
  0x30   : > { %p2203_p1 = scmp.ne.s32.totalorder %s2837_s7, %s2202_s29  ;;  %p2209_p8 = scmp.lt.u32.totalorder %s2202_s29, %s2837_s7 }
  0x32   : > { %p2205_p4 = pnand %p2203_p1, %p2533_p9 }
  0x34   : > { %p2206_p5 = pneg %p2205_p4 }
  0x36   : > { %p2211_p10 = pnand %p2209_p8, %p2206_p5 }
  0x38   : > { %2214 = shalt.err (!%p2211_p10)
}
  0x39   : > { %s2215_s19 = scalar_lea.vmem %s2523_s22, 3072  ;;  %p2223_p0 = scmp.lt.s32.totalorder %s2523_s22, %s2523_s22 }
  0x3a   : > { %p2216_p11 = scmp.ne.s32.totalorder %s2523_s22, %s2215_s19  ;;  %p2224_p2 = scmp.lt.s32.totalorder %s2215_s19, %s2215_s19 }
  0x3c   : > { %p2218_p12 = pnand %p2216_p11, %p2533_p9  ;;  %p2225_p3 = por %p2224_p2, %p2223_p0 }
  0x3e   : > { %p2219_p13 = pneg %p2218_p12 }
  0x40   : > { %p2226_p6 = pnand %p2225_p3, %p2219_p13 }
  0x42   : > { %2229 = shalt.err (!%p2226_p6)
}
  0x43   : > { %2045 = dma.hbm_to_vmem [thread:$0]  (!%p2519_p7), %s2837_s7, 3072, %s2523_s22, [#allocation11], %s2412_s21, %s2412_s21, %s2413_s23  }
  0x44   : > { %s2414_s24 = smov [#allocation4]   ;;  %s2415_s26 = smov [#allocation9]  }
  0x45   : > { %s282_s25 = sshll.u32 %s2414_s24, 4  ;;  %s308_s27 = sshll.u32 %s2415_s26, 4  ;;  %s283_s25 = int_to_ptr.vmem [resolvable:$true] %s282_s25  ;;  %s2578_s27 = int_to_ptr.vmem [resolvable:$true] %s308_s27 }
  0x46   : > { %s2230_s18 = scalar_lea.hbm %s2830_s0, 1024 }
  0x47   : > { %p2231_p1 = scmp.ne.s32.totalorder %s2830_s0, %s2230_s18  ;;  %p2237_p8 = scmp.lt.u32.totalorder %s2230_s18, %s2830_s0 }
  0x49   : > { %p2233_p4 = pnand %p2231_p1, %p2533_p9 }
  0x4b   : > { %p2234_p5 = pneg %p2233_p4 }
  0x4d   : > { %p2239_p10 = pnand %p2237_p8, %p2234_p5 }
  0x4f   : > { %2242 = shalt.err (!%p2239_p10)
}
  0x50   : > { %s2243_s9 = scalar_lea.vmem %s283_s25, 1024  ;;  %p2251_p0 = scmp.lt.s32.totalorder %s283_s25, %s283_s25 }
  0x51   : > { %p2244_p11 = scmp.ne.s32.totalorder %s283_s25, %s2243_s9  ;;  %p2252_p2 = scmp.lt.s32.totalorder %s2243_s9, %s2243_s9 }
  0x53   : > { %p2246_p12 = pnand %p2244_p11, %p2533_p9  ;;  %p2253_p3 = por %p2252_p2, %p2251_p0 }
  0x55   : > { %p2247_p13 = pneg %p2246_p12 }
  0x57   : > { %p2254_p6 = pnand %p2253_p3, %p2247_p13 }
  0x59   : > { %2257 = shalt.err (!%p2254_p6)
}
  0x5a   : > { %2036 = dma.hbm_to_vmem [thread:$0]  (!%p2519_p7), %s2830_s0, 1024, %s283_s25, [#allocation5], %s2412_s21, %s2412_s21, %s2413_s23  }
  0x5b   : > { %s2258_s30 = scalar_lea.hbm %s2832_s2, 1024 }
  0x5c   : > { %p2259_p1 = scmp.ne.s32.totalorder %s2832_s2, %s2258_s30  ;;  %p2265_p8 = scmp.lt.u32.totalorder %s2258_s30, %s2832_s2 }
  0x5e   : > { %p2261_p4 = pnand %p2259_p1, %p2533_p9 }
  0x60   : > { %p2262_p5 = pneg %p2261_p4 }
  0x62   : > { %p2267_p10 = pnand %p2265_p8, %p2262_p5 }
  0x64   : > { %2270 = shalt.err (!%p2267_p10)
}
  0x65   : > { %s2271_s25 = scalar_lea.vmem %s2578_s27, 1024  ;;  %p2279_p0 = scmp.lt.s32.totalorder %s2578_s27, %s2578_s27 }
  0x66   : > { %p2272_p11 = scmp.ne.s32.totalorder %s2578_s27, %s2271_s25  ;;  %p2280_p2 = scmp.lt.s32.totalorder %s2271_s25, %s2271_s25 }
  0x68   : > { %p2274_p12 = pnand %p2272_p11, %p2533_p9  ;;  %p2281_p3 = por %p2280_p2, %p2279_p0 }
  0x6a   : > { %p2275_p13 = pneg %p2274_p12 }
  0x6c   : > { %p2282_p6 = pnand %p2281_p3, %p2275_p13 }
  0x6e   : > { %2285 = shalt.err (!%p2282_p6)
}
  0x6f   : > { %2042 = dma.hbm_to_vmem [thread:$0]  (!%p2519_p7), %s2832_s2, 1024, %s2578_s27, [#allocation8], %s2412_s21, %s2412_s21, %s2413_s23  }
  0x70   : > { %s37_s20 = sadd.s32 1, %s2404_s13  ;;  %s133_s28 = sadd.s32 1, %s2396_s11 }
  0x71   : > { %p39_p9 = scmp.ge.s32.totalorder %s37_s20, 2  ;;  %p140_p1 = scmp.ne.s32.totalorder %s2396_s11, %s2392_s10 }
  0x72   : > { %p141_p4 = scmp.eq.s32.totalorder %s2408_s14, 0  ;;  %p2054_p5 = scmp.lt.s32.totalorder %s2408_s14, 2 }
  0x73   : > { %s2870_s20 = smov (%p39_p9, %s37_s20), 0  ;;  %s344_s24 = sand.u32 1, %s2408_s14  }
  0x74   : > { %p142_p8 = por %p141_p4, %p140_p1  ;;  %s130_s26 = ssub.s32 %s2404_s13, %s2870_s20 }
  0x75   : > { %p131_p10 = scmp.eq.s32.totalorder %s130_s26, 0  ;;  %s346_s29 = sand.u32 1, %s2396_s11  }
  0x76   : > { %s1655_s30 = sshll.u32 %s346_s29, 6  ;;  %s1733_s18 = sshll.u32 %s2404_s13, 10 }
  0x77   : > { %s2641_s19 = scalar_select %p131_p10, %s2396_s11, %s133_s28  }
  0x78   : > { %s2646_s22 = scalar_lea.hbm %s2834_s4, %s1733_s18  ;;  %s348_s25 = scalar_lea.vmem [#allocation10], %s1655_s30 }
  0x79   : > { %s355_s9 = sshll.u32 %s348_s25, 4  ;;  %p2650_p7 = pnand %p2054_p5, %p142_p8  ;;  %s2654_s9 = int_to_ptr.vmem [resolvable:$true] %s355_s9 }
  0x7a   : > { %s2656_s28 = scalar_lea.sflag [#allocation11], %s344_s24  ;;  %s2286_s26 = scalar_lea.hbm %s2646_s22, 1024 }
  0x7b   : > { %p2287_p11 = scmp.ne.s32.totalorder %s2646_s22, %s2286_s26  ;;  %p2288_p12 = pneg %p2650_p7 }
  0x7c   : > { %s2291_s18 = scalar_lea.hbm %s2834_s4, 2048  ;;  %p2292_p2 = scmp.lt.u32.totalorder %s2646_s22, %s2834_s4 }
  0x7d   : > { %p2289_p13 = pnand %p2288_p12, %p2287_p11  ;;  %p2293_p3 = scmp.lt.u32.totalorder %s2291_s18, %s2286_s26 }
  0x7e   : > { %p2295_p9 = scmp.lt.u32.totalorder %s2286_s26, %s2646_s22 }
  0x7f   : > { %p2290_p0 = pneg %p2289_p13  ;;  %p2294_p6 = por %p2293_p3, %p2292_p2 }
  0x81   : > { %p2296_p1 = por %p2295_p9, %p2294_p6 }
  0x83   : > { %p2297_p4 = pnand %p2296_p1, %p2290_p0 }
  0x85   : > { %2300 = shalt.err (!%p2297_p4)
}
  0x86   : > { %s2301_s24 = scalar_lea.vmem %s2654_s9, 1024  ;;  %s2416_s25 = smov [#allocation10]  }
  0x87   : > { %p2302_p5 = scmp.ne.s32.totalorder %s2654_s9, %s2301_s24  ;;  %s2306_s29 = sshll.u32 %s2416_s25, 4  ;;  %s2307_s29 = int_to_ptr.vmem [resolvable:$false] %s2306_s29 }
  0x88   : > { %s2308_s30 = scalar_lea.vmem %s2307_s29, 2048  ;;  %p2309_p11 = scmp.lt.s32.totalorder %s2654_s9, %s2307_s29 }
  0x89   : > { %p2304_p8 = pnand %p2302_p5, %p2288_p12  ;;  %p2310_p13 = scmp.lt.s32.totalorder %s2308_s30, %s2301_s24 }
  0x8b   : > { %p2305_p10 = pneg %p2304_p8  ;;  %p2311_p2 = por %p2310_p13, %p2309_p11 }
  0x8d   : > { %p2312_p3 = pnand %p2311_p2, %p2305_p10 }
  0x8f   : > { %2315 = shalt.err (!%p2312_p3)
}
  0x90   : > { %2049 = dma.hbm_to_vmem [thread:$0]  (!%p2650_p7), %s2646_s22, 1024, %s2654_s9, %s2656_s28, %s2412_s21, %s2412_s21, %s2413_s23  }
  0x91   : > { %p2854_p12 = scmp.ne.s32.totalorder %s2849_s17, 0 }
  0x92   : > { %p2855_p0 = scmp.eq.s32.totalorder (!%p2854_p12), %s2499_s15, 0 }
  0x93   : > { %373 = sbr.rel (%p2854_p12) target bundleno = 1867 (0x74b), region = 56 }
  0x9a   : > { %2367 = dma.done.wait (%p2855_p0), [#allocation5], 1024   ;;  %p2856_p6 = pmov %p2855_p0 }
  0x9b   : > { %p2857_p9 = pmov %p2855_p0 }
  0x9c   : > { %2369 = vsyncadd (%p2856_p6), [#allocation5], 4294966272 }
  0x9d   : > { %2371 = dma.done.wait (%p2857_p9), [#allocation8], 2048   ;;  %p2858_p1 = pmov %p2855_p0 }
  0x9e   : > { %s387_s1 = sand.u32 1, %s2499_s15   ;;  %s389_s21 = sand.u32 1, %s2392_s10  }
  0x9f   : > { %2373 = vsyncadd (%p2858_p1), [#allocation8], 4294965248  ;;  %s1662_s23 = sshll.u32 %s389_s21, 6  ;;  %s388_s17 = scalar_lea.sflag [#allocation11], %s387_s1 }
  0xa0   : > { %s2699_s22 = scalar_lea.vmem [#allocation10], %s1662_s23  ;;  %p2859_p7 = scmp.ne.s32.totalorder %s2848_s16, 0 }
  0xa2   : > { %2375 = dma.done.wait (%p2859_p7), %s388_s17, 1024  }
  0xa3   : > { %2377 = vsyncadd (%p2859_p7), %s388_s17, 4294966272  ;;  %p2860_p4 = pmov %p2855_p0 }
  0xa4   : > { %p2861_p5 = pmov %p2855_p0 }
  0xa5   : > { %2379 = dma.done.wait (%p2860_p4), [#allocation11], 3072  }
  0xa6   : > { %2381 = vsyncadd (%p2861_p5), [#allocation11], 4294964224  ;;  %p429_p8 = scmp.lt.s32.totalorder %s2400_s12, 1  ;;  %p1664_p10 = scmp.ne.s32.totalorder %s2400_s12, 0 }
  0xa7   : > { %v2118_v0 = vld [vmem:[#allocation9] sm:$0xff] (!%p1664_p10)   ;;  %v2119_v1 = vld [vmem:[#allocation9 + $0x8] sm:$0xff] (!%p1664_p10)   ;;  %v2120_v2 = vld [vmem:[#allocation9 + $0x10] sm:$0xff] (!%p1664_p10)  }
  0xa8   : > { %s2711_s9 = scalar_select %p429_p8, %s2400_s12, 1 }
  0xa9   : > { %440 = sbr.rel (%p1664_p10) target bundleno = 429 (0x1ad), region = 84  ;;  %1819 = vmatprep.subr.bf16.mxu0 (!%p1664_p10), %v2118_v0  ;;  %1995 = vmatprep.subr.bf16.mxu1 (!%p1664_p10), %v2118_v0  ;;  %v2121_v3 = vld [vmem:[#allocation9 + $0x18] sm:$0xff] (!%p1664_p10)   ;;  %v2126_v4 = vld [vmem:[#allocation7] sm:$0xff] (!%p1664_p10)   ;;  %v2123_v7 = vld [vmem:[#allocation9 + $0x28] sm:$0xff] (!%p1664_p10)  }
  0xaa   : > { %s431_s18 = scalar_lea.vmem %s2835_s5, %s2711_s9  ;;  %1820 = vmatpush3.bf16.msra.mxu0 (!%p1664_p10), %v2118_v0  ;;  %2003 = vmatpush3.bf16.msra.mxu1 (!%p1664_p10), %v2118_v0  ;;  %v2127_v5 = vld [vmem:[#allocation7 + $0x20] sm:$0xff] (!%p1664_p10)   ;;  %v2124_v8 = vld [vmem:[#allocation9 + $0x30] sm:$0xff] (!%p1664_p10)   ;;  %v2125_v9 = vld [vmem:[#allocation9 + $0x38] sm:$0xff] (!%p1664_p10)  }
  0xab   : > { %1821 = vmatprep.subr.bf16.mxu0 (!%p1664_p10), %v2119_v1  ;;  %1996 = vmatprep.subr.bf16.mxu1 (!%p1664_p10), %v2119_v1  ;;  %v2122_v6 = vld [vmem:[#allocation9 + $0x20] sm:$0xff] (!%p1664_p10)   ;;  %v2128_v10 = vld [vmem:[#allocation7 + $0x8] sm:$0xff] (!%p1664_p10)   ;;  %v2130_v12 = vld [vmem:[#allocation7 + $0x10] sm:$0xff] (!%p1664_p10)  }
  0xac   : > { %1835 = vmatprep.mubr.bf16.mxu0 (!%p1664_p10), %v2126_v4  ;;  %1843 = vmatprep.mubr.bf16.mxu1 (!%p1664_p10), %v2127_v5  ;;  %v2129_v11 = vld [vmem:[#allocation7 + $0x28] sm:$0xff] (!%p1664_p10)   ;;  %v2131_v13 = vld [vmem:[#allocation7 + $0x30] sm:$0xff] (!%p1664_p10)   ;;  %v2132_v14 = vld [vmem:[#allocation7 + $0x18] sm:$0xff] (!%p1664_p10)  }
  0xad   : > { %v2133_v15 = vld [vmem:[#allocation7 + $0x38] sm:$0xff] (!%p1664_p10)   ;;  %v1665_v16 = vld [vmem:[%s2833_s3] ss:$0 sm:$0xff] (!%p1664_p10) }
  0xae   : > { %1822 = vmatpush3.bf16.msra.mxu0 (!%p1664_p10), %v2119_v1  ;;  %2004 = vmatpush3.bf16.msra.mxu1 (!%p1664_p10), %v2119_v1 }
  0xaf   : > { %1823 = vmatprep.subr.bf16.mxu0 (!%p1664_p10), %v2120_v2  ;;  %1997 = vmatprep.subr.bf16.mxu1 (!%p1664_p10), %v2120_v2 }
  0xb2   : > { %1824 = vmatpush3.bf16.msra.mxu0 %v2120_v2  ;;  %2005 = vmatpush3.bf16.msra.mxu1 %v2120_v2 }
  0xb3   : > { %1825 = vmatprep.subr.bf16.mxu0 %v2121_v3  ;;  %1998 = vmatprep.subr.bf16.mxu1 %v2121_v3 }
  0xb6   : > { %1826 = vmatpush3.bf16.msra.mxu0 %v2121_v3  ;;  %2006 = vmatpush3.bf16.msra.mxu1 %v2121_v3 }
  0xb7   : > { %1827 = vmatprep.subr.bf16.mxu0 %v2122_v6  ;;  %1999 = vmatprep.subr.bf16.mxu1 %v2122_v6 }
  0xba   : > { %1828 = vmatpush3.bf16.msra.mxu0 %v2122_v6  ;;  %2007 = vmatpush3.bf16.msra.mxu1 %v2122_v6 }
  0xbb   : > { %1829 = vmatprep.subr.bf16.mxu0 %v2123_v7  ;;  %2000 = vmatprep.subr.bf16.mxu1 %v2123_v7 }
  0xbe   : > { %1830 = vmatpush3.bf16.msra.mxu0 %v2123_v7  ;;  %2008 = vmatpush3.bf16.msra.mxu1 %v2123_v7 }
  0xbf   : > { %1831 = vmatprep.subr.bf16.mxu0 %v2124_v8  ;;  %2001 = vmatprep.subr.bf16.mxu1 %v2124_v8 }
  0xc2   : > { %1832 = vmatpush3.bf16.msra.mxu0 %v2124_v8  ;;  %2009 = vmatpush3.bf16.msra.mxu1 %v2124_v8 }
  0xc3   : > { %1833 = vmatprep.subr.bf16.mxu0 %v2125_v9  ;;  %2002 = vmatprep.subr.bf16.mxu1 %v2125_v9 }
  0xc6   : > { %1834 = vmatpush3.bf16.msra.mxu0 %v2125_v9  ;;  %2010 = vmatpush3.bf16.msra.mxu1 %v2125_v9 }
  0xc9   : > { %1836 = vmatmul.mubr.bf16.vlgmr.msra.gmra.mrb[0].mxu0 %v2128_v10  ;;  %1844 = vmatmul.mubr.bf16.vlgmr.msra.gmra.mrb[0].mxu1 %v2129_v11 }
  0xca   : > { %1839 = vmatprep.mubr.bf16.mxu0 %v2130_v12  ;;  %1847 = vmatprep.mubr.bf16.mxu1 %v2131_v13 }
  0xd1   : > { %1840 = vmatmul.mubr.bf16.gmra.mrb[4].mxu0 %v2132_v14  ;;  %1848 = vmatmul.mubr.bf16.gmra.mrb[4].mxu1 %v2133_v15 }
 0x19c   : > { %v1837_v17 = vpop.f32.mrb[0].mxu0  ;;  %v1845_v18 = vpop.f32.mrb[0].mxu1 }
 0x19d   : > { %v619_v19 = vadd.f32 %v1837_v17, %v1665_v16  ;;  %v651_v20 = vadd.f32 %v1845_v18, %v1665_v16  ;;  %v610_v21 = vpop.f32.mrb[1].mxu0  ;;  %v642_v22 = vpop.f32.mrb[1].mxu1 }
 0x19e   : > { %v611_v23 = vadd.f32 %v1665_v16, %v610_v21  ;;  %v643_v24 = vadd.f32 %v1665_v16, %v642_v22  ;;  %v1838_v25 = vpop.f32.mrb[2].mxu0  ;;  %v1846_v26 = vpop.f32.mrb[2].mxu1 }
 0x19f   : > { %v675_v27 = vmax.f32 %v619_v19, 0.0  ;;  %v683_v28 = vmax.f32 %v651_v20, 0.0  ;;  %v622_v29 = vadd.f32 %v1838_v25, %v1665_v16  ;;  %v654_v30 = vadd.f32 %v1846_v26, %v1665_v16  ;;  %v613_v31 = vpop.f32.mrb[3].mxu0  ;;  %v645_v32 = vpop.f32.mrb[3].mxu1 }
 0x1a0   : > { %v673_v33 = vmax.f32 %v611_v23, 0.0  ;;  %v681_v34 = vmax.f32 %v643_v24, 0.0  ;;  %v614_v35 = vadd.f32 %v1665_v16, %v613_v31  ;;  %v646_v36 = vadd.f32 %v1665_v16, %v645_v32 }
 0x1a1   : > { %691 = vst [vmem:[#allocation2 + $0x10] sm:$0xff] %v675_v27  ;;  %699 = vst [vmem:[#allocation2 + $0x50] sm:$0xff] %v683_v28  ;;  %v676_v37 = vmax.f32 %v622_v29, 0.0  ;;  %v684_v38 = vmax.f32 %v654_v30, 0.0 }
 0x1a2   : > { %689 = vst [vmem:[#allocation2] sm:$0xff] %v673_v33  ;;  %697 = vst [vmem:[#allocation2 + $0x40] sm:$0xff] %v681_v34  ;;  %v674_v39 = vmax.f32 %v614_v35, 0.0  ;;  %v682_v40 = vmax.f32 %v646_v36, 0.0 }
 0x1a3   : > { %692 = vst [vmem:[#allocation2 + $0x18] sm:$0xff] %v676_v37  ;;  %700 = vst [vmem:[#allocation2 + $0x58] sm:$0xff] %v684_v38 }
 0x1a4   : > { %690 = vst [vmem:[#allocation2 + $0x8] sm:$0xff] %v674_v39  ;;  %698 = vst [vmem:[#allocation2 + $0x48] sm:$0xff] %v682_v40  ;;  %v1841_v41 = vpop.f32.mrb[4].mxu0  ;;  %v1849_v42 = vpop.f32.mrb[4].mxu1 }
 0x1a5   : > { %v635_v43 = vadd.f32 %v1841_v41, %v1665_v16  ;;  %v667_v44 = vadd.f32 %v1849_v42, %v1665_v16  ;;  %v626_v45 = vpop.f32.mrb[5].mxu0  ;;  %v658_v46 = vpop.f32.mrb[5].mxu1 }
 0x1a6   : > { %v627_v47 = vadd.f32 %v1665_v16, %v626_v45  ;;  %v659_v48 = vadd.f32 %v1665_v16, %v658_v46  ;;  %v1842_v49 = vpop.f32.mrb[6].mxu0  ;;  %v1850_v50 = vpop.f32.mrb[6].mxu1 }
 0x1a7   : > { %v679_v51 = vmax.f32 %v635_v43, 0.0  ;;  %v687_v52 = vmax.f32 %v667_v44, 0.0  ;;  %v638_v53 = vadd.f32 %v1842_v49, %v1665_v16  ;;  %v670_v54 = vadd.f32 %v1850_v50, %v1665_v16  ;;  %v629_v55 = vpop.f32.mrb[7].mxu0  ;;  %v661_v56 = vpop.f32.mrb[7].mxu1 }
 0x1a8   : > { %v677_v57 = vmax.f32 %v627_v47, 0.0  ;;  %v685_v58 = vmax.f32 %v659_v48, 0.0  ;;  %v630_v59 = vadd.f32 %v1665_v16, %v629_v55  ;;  %v662_v60 = vadd.f32 %v1665_v16, %v661_v56 }
 0x1a9   : > { %695 = vst [vmem:[#allocation2 + $0x30] sm:$0xff] %v679_v51  ;;  %703 = vst [vmem:[#allocation2 + $0x70] sm:$0xff] %v687_v52  ;;  %v680_v61 = vmax.f32 %v638_v53, 0.0  ;;  %v688_v62 = vmax.f32 %v670_v54, 0.0 }
 0x1aa   : > { %693 = vst [vmem:[#allocation2 + $0x20] sm:$0xff] %v677_v57  ;;  %701 = vst [vmem:[#allocation2 + $0x60] sm:$0xff] %v685_v58  ;;  %v678_v63 = vmax.f32 %v630_v59, 0.0  ;;  %v686_v0 = vmax.f32 %v662_v60, 0.0 }
 0x1ab   : > { %696 = vst [vmem:[#allocation2 + $0x38] sm:$0xff] %v680_v61  ;;  %704 = vst [vmem:[#allocation2 + $0x78] sm:$0xff] %v688_v62 }
 0x1ac   : > { %694 = vst [vmem:[#allocation2 + $0x28] sm:$0xff] %v678_v63  ;;  %702 = vst [vmem:[#allocation2 + $0x68] sm:$0xff] %v686_v0 }
 0x1ad PF: > { %v2134_v1 = vld [vmem:[%s2699_s22] sm:$0xff]   ;;  %v2135_v2 = vld [vmem:[%s2699_s22 + $0x8] sm:$0xff]   ;;  %v2136_v3 = vld [vmem:[%s2699_s22 + $0x10] sm:$0xff]   ;;  %p1116_p11 = scmp.eq.s32.totalorder %s2400_s12, 1 }
 0x1ae   : > { %1851 = vmatprep.subr.bf16.mxu0 %v2134_v1  ;;  %v2137_v4 = vld [vmem:[%s2699_s22 + $0x18] sm:$0xff]   ;;  %v705_v5 = vld [vmem:[#allocation2] sm:$0xff]  ;;  %v706_v6 = vld [vmem:[#allocation2 + $0x8] sm:$0xff]  ;;  %vm2418_vm0 = vmmov (%p1116_p11), 0   ;;  %s2862_s1 = sld [smem:[#allocation20_spill]] (%p1116_p11) }
 0x1af   : > { %1852 = vmatpush3.bf16.msra.mxu0 %v2134_v1  ;;  %v721_v7 = vpack.c.bf16 %v706_v6, %v705_v5  ;;  %v2138_v8 = vld [vmem:[%s2699_s22 + $0x20] sm:$0xff]   ;;  %v2139_v9 = vld [vmem:[%s2699_s22 + $0x28] sm:$0xff]   ;;  %v2140_v10 = vld [vmem:[%s2699_s22 + $0x30] sm:$0xff]  }
 0x1b0   : > { %1853 = vmatprep.subr.bf16.mxu0 %v2135_v2  ;;  %v2141_v11 = vld [vmem:[%s2699_s22 + $0x38] sm:$0xff]   ;;  %v707_v12 = vld [vmem:[#allocation2 + $0x10] sm:$0xff]  ;;  %v713_v20 = vld [vmem:[#allocation2 + $0x40] sm:$0xff] }
 0x1b1   : > { %1867 = vmatprep.mubr.bf16.mxu0 %v721_v7  ;;  %v708_v13 = vld [vmem:[#allocation2 + $0x18] sm:$0xff]  ;;  %v709_v14 = vld [vmem:[#allocation2 + $0x20] sm:$0xff]  ;;  %v711_v18 = vld [vmem:[#allocation2 + $0x30] sm:$0xff] }
 0x1b2   : > { %v722_v16 = vpack.c.bf16 %v708_v13, %v707_v12  ;;  %v712_v19 = vld [vmem:[#allocation2 + $0x38] sm:$0xff]  ;;  %v714_v21 = vld [vmem:[#allocation2 + $0x48] sm:$0xff]  ;;  %v715_v24 = vld [vmem:[#allocation2 + $0x50] sm:$0xff] }
 0x1b3   : > { %1854 = vmatpush3.bf16.msra.mxu0 %v2135_v2  ;;  %v710_v15 = vld [vmem:[#allocation2 + $0x28] sm:$0xff]  ;;  %v724_v22 = vpack.c.bf16 %v712_v19, %v711_v18  ;;  %v725_v23 = vpack.c.bf16 %v714_v21, %v713_v20  ;;  %v716_v25 = vld [vmem:[#allocation2 + $0x58] sm:$0xff]  ;;  %v717_v26 = vld [vmem:[#allocation2 + $0x60] sm:$0xff] }
 0x1b4   : > { %1855 = vmatprep.subr.bf16.mxu0 %v2136_v3  ;;  %v723_v17 = vpack.c.bf16 %v710_v15, %v709_v14  ;;  %v718_v27 = vld [vmem:[#allocation2 + $0x68] sm:$0xff]  ;;  %v726_v28 = vpack.c.bf16 %v716_v25, %v715_v24  ;;  %v719_v30 = vld [vmem:[#allocation2 + $0x70] sm:$0xff]  ;;  %v720_v31 = vld [vmem:[#allocation2 + $0x78] sm:$0xff] }
 0x1b5   : > { %v727_v29 = vpack.c.bf16 %v718_v27, %v717_v26  ;;  %v728_v32 = vpack.c.bf16 %v720_v31, %v719_v30  ;;  %v2142_v33 = vld [vmem:[#allocation4] sm:$0xff]   ;;  %v2143_v58 = vld [vmem:[#allocation4 + $0x8] sm:$0xff]   ;;  %v2144_v59 = vld [vmem:[#allocation4 + $0x10] sm:$0xff]  }
 0x1b6   : > { %1899 = vmatprep.mubr.bf16.mxu1 %v2142_v33  ;;  %v2145_v60 = vld [vmem:[#allocation4 + $0x18] sm:$0xff]   ;;  %v2146_v61 = vld [vmem:[#allocation4 + $0x20] sm:$0xff]   ;;  %v2147_v62 = vld [vmem:[#allocation4 + $0x28] sm:$0xff]  }
 0x1b7   : > { %1856 = vmatpush3.bf16.msra.mxu0 %v2136_v3  ;;  %v2148_v63 = vld [vmem:[#allocation4 + $0x30] sm:$0xff]   ;;  %v2149_v0 = vld [vmem:[#allocation4 + $0x38] sm:$0xff]   ;;  %v1690_v1 = vld [vmem:[%s431_s18] ss:$0 sm:$0xff] }
 0x1b8   : > { %1857 = vmatprep.subr.bf16.mxu0 %v2137_v4 }
 0x1bb   : > { %1858 = vmatpush3.bf16.msra.mxu0 %v2137_v4 }
 0x1bc   : > { %1859 = vmatprep.subr.bf16.mxu0 %v2138_v8 }
 0x1bf   : > { %1860 = vmatpush3.bf16.msra.mxu0 %v2138_v8 }
 0x1c0   : > { %1861 = vmatprep.subr.bf16.mxu0 %v2139_v9 }
 0x1c3   : > { %1862 = vmatpush3.bf16.msra.mxu0 %v2139_v9 }
 0x1c4   : > { %1863 = vmatprep.subr.bf16.mxu0 %v2140_v10 }
 0x1c7   : > { %1864 = vmatpush3.bf16.msra.mxu0 %v2140_v10 }
 0x1c8   : > { %1865 = vmatprep.subr.bf16.mxu0 %v2141_v11 }
 0x1cb   : > { %1866 = vmatpush3.bf16.msra.mxu0 %v2141_v11 }
 0x1ce   : > { %1868 = vmatmul.mubr.bf16.vlgmr.msra.gmra.mrb[0].mxu0 %v722_v16 }
 0x1cf   : > { %1871 = vmatprep.mubr.bf16.mxu0 %v723_v17 }
 0x1d6   : > { %1872 = vmatmul.mubr.bf16.gmra.mrb[4].mxu0 %v724_v22 }
 0x1d7   : > { %1875 = vmatprep.mubr.bf16.mxu0 %v725_v23 }
 0x1de   : > { %1876 = vmatmul.mubr.bf16.gmra.mrb[8].mxu0 %v726_v28 }
 0x1df   : > { %1879 = vmatprep.mubr.bf16.mxu0 %v727_v29 }
 0x1e6   : > { %1880 = vmatmul.mubr.bf16.gmra.mrb[12].mxu0 %v728_v32 }
 0x2a1   : > { %v1869_v34 = vpop.f32.mrb[0].mxu0 }
 0x2a2   : > { %v827_v35 = vpop.f32.mrb[1].mxu0 }
 0x2a3   : > { %v1870_v36 = vpop.f32.mrb[2].mxu0 }
 0x2a4   : > { %v891_v37 = vpack.c.bf16 %v1870_v36, %v1869_v34  ;;  %v830_v38 = vpop.f32.mrb[3].mxu0 }
 0x2a5   : > { %v890_v39 = vpack.c.bf16 %v830_v38, %v827_v35 }
 0x2a7   : > { %1883 = vmatprep.subr.bf16.mxu1 %v890_v39 }
 0x2a8   : > { %1884 = vmatpush3.bf16.msra.mxu1 %v890_v39 }
 0x2a9   : > { %v1873_v40 = vpop.f32.mrb[4].mxu0  ;;  %1885 = vmatprep.subr.bf16.mxu1 %v891_v37 }
 0x2aa   : > { %v843_v41 = vpop.f32.mrb[5].mxu0 }
 0x2ab   : > { %v1874_v42 = vpop.f32.mrb[6].mxu0 }
 0x2ac   : > { %v893_v43 = vpack.c.bf16 %v1874_v42, %v1873_v40  ;;  %v846_v44 = vpop.f32.mrb[7].mxu0  ;;  %1886 = vmatpush3.bf16.msra.mxu1 %v891_v37 }
 0x2ad   : > { %v892_v45 = vpack.c.bf16 %v846_v44, %v843_v41 }
 0x2af   : > { %1887 = vmatprep.subr.bf16.mxu1 %v892_v45 }
 0x2b0   : > { %1888 = vmatpush3.bf16.msra.mxu1 %v892_v45 }
 0x2b1   : > { %v1877_v46 = vpop.f32.mrb[8].mxu0  ;;  %1889 = vmatprep.subr.bf16.mxu1 %v893_v43 }
 0x2b2   : > { %v859_v47 = vpop.f32.mrb[9].mxu0 }
 0x2b3   : > { %v1878_v48 = vpop.f32.mrb[10].mxu0 }
 0x2b4   : > { %v895_v49 = vpack.c.bf16 %v1878_v48, %v1877_v46  ;;  %v862_v50 = vpop.f32.mrb[11].mxu0  ;;  %1890 = vmatpush3.bf16.msra.mxu1 %v893_v43 }
 0x2b5   : > { %v894_v51 = vpack.c.bf16 %v862_v50, %v859_v47 }
 0x2b7   : > { %1891 = vmatprep.subr.bf16.mxu1 %v894_v51 }
 0x2b8   : > { %1892 = vmatpush3.bf16.msra.mxu1 %v894_v51 }
 0x2b9   : > { %v1881_v52 = vpop.f32.mrb[12].mxu0  ;;  %1893 = vmatprep.subr.bf16.mxu1 %v895_v49 }
 0x2ba   : > { %v875_v53 = vpop.f32.mrb[13].mxu0 }
 0x2bb   : > { %v1882_v54 = vpop.f32.mrb[14].mxu0 }
 0x2bc   : > { %v897_v55 = vpack.c.bf16 %v1882_v54, %v1881_v52  ;;  %v878_v56 = vpop.f32.mrb[15].mxu0  ;;  %1894 = vmatpush3.bf16.msra.mxu1 %v895_v49 }
 0x2bd   : > { %v896_v57 = vpack.c.bf16 %v878_v56, %v875_v53  ;;  %v2417_v53 = vmov (%p1116_p11), 0.0  }
 0x2be   : > { %1915 = vmatprep.subr.bf16.mxu0 (%p1116_p11), %v2417_v53  ;;  %1931 = vmatprep.mubr.msk.bf16.mxu0 (%p1116_p11), %vm2418_vm0, %v2417_v53 }
 0x2bf   : > { %1895 = vmatprep.subr.bf16.mxu1 %v896_v57 }
 0x2c0   : > { %1896 = vmatpush3.bf16.msra.mxu1 %v896_v57 }
 0x2c1   : > { %1897 = vmatprep.subr.bf16.mxu1 %v897_v55 }
 0x2c4   : > { %1898 = vmatpush3.bf16.msra.mxu1 %v897_v55 }
 0x2c5   : > { %1935 = vmatprep.subr.bf16.mxu1 (%p1116_p11), %v2417_v53 }
 0x2c7   : > { %1900 = vmatmul.mubr.bf16.vlgmr.msra.gmra.mrb[0].mxu1 %v2143_v58 }
 0x2c8   : > { %1903 = vmatprep.mubr.bf16.mxu1 %v2144_v59 }
 0x2cf   : > { %1904 = vmatmul.mubr.bf16.gmra.mrb[4].mxu1 %v2145_v60  ;;  %v2150_v60 = vld [vmem:[#allocation12] sm:$0xff] (%p1116_p11)  }
 0x2d0   : > { %1907 = vmatprep.mubr.bf16.mxu1 %v2146_v61  ;;  %1936 = vmatpush3.bf16.msra.mxu1 (%p1116_p11), %v2150_v60 }
 0x2d1   : > { %1937 = vmatprep.subr.bf16.mxu1 (%p1116_p11), %v2417_v53 }
 0x2d7   : > { %1908 = vmatmul.mubr.bf16.gmra.mrb[8].mxu1 %v2147_v62 }
 0x2d8   : > { %1911 = vmatprep.mubr.bf16.mxu1 %v2148_v63  ;;  %v2151_v63 = vld [vmem:[#allocation12 + $0x8] sm:$0xff] (%p1116_p11)  }
 0x2d9   : > { %1938 = vmatpush3.bf16.msra.mxu1 (%p1116_p11), %v2151_v63 }
 0x2da   : > { %1939 = vmatprep.subr.bf16.mxu1 (%p1116_p11), %v2417_v53 }
 0x2df   : > { %1912 = vmatmul.mubr.bf16.gmra.mrb[12].mxu1 %v2149_v0 }
 0x2e0   : > { %1951 = vmatprep.mubr.msk.bf16.mxu1 (%p1116_p11), %vm2418_vm0, %v2417_v53 }
 0x39a   : > { %v1901_v2 = vpop.f32.mrb[0].mxu1 }
 0x39b   : > { %v1028_v3 = vadd.f32 %v1901_v2, %v1690_v1  ;;  %v1019_v4 = vpop.f32.mrb[1].mxu1 }
 0x39c   : > { %v1020_v5 = vadd.f32 %v1690_v1, %v1019_v4  ;;  %v1902_v6 = vpop.f32.mrb[2].mxu1 }
 0x39d   : > { %v1084_v7 = vmax.f32 %v1028_v3, 0.0  ;;  %v1031_v8 = vadd.f32 %v1902_v6, %v1690_v1  ;;  %v1022_v9 = vpop.f32.mrb[3].mxu1  ;;  %v2152_v3 = vld [vmem:[#allocation12 + $0x10] sm:$0xff] (%p1116_p11)   ;;  %v2153_v6 = vld [vmem:[#allocation12 + $0x18] sm:$0xff] (%p1116_p11)  }
 0x39e   : > { %v1082_v10 = vmax.f32 %v1020_v5, 0.0  ;;  %v1023_v11 = vadd.f32 %v1690_v1, %v1022_v9  ;;  %1940 = vmatpush3.bf16.msra.mxu1 (%p1116_p11), %v2152_v3 }
 0x39f   : > { %1102 = vst [vmem:[#allocation2 + $0x10] sm:$0xff] %v1084_v7  ;;  %v1085_v12 = vmax.f32 %v1031_v8, 0.0  ;;  %1941 = vmatprep.subr.bf16.mxu1 (%p1116_p11), %v2417_v53 }
 0x3a0   : > { %1100 = vst [vmem:[#allocation2] sm:$0xff] %v1082_v10  ;;  %v1083_v13 = vmax.f32 %v1023_v11, 0.0  ;;  %v2154_v10 = vld [vmem:[#allocation12 + $0x20] sm:$0xff] (%p1116_p11)  }
 0x3a1   : > { %1103 = vst [vmem:[#allocation2 + $0x18] sm:$0xff] %v1085_v12 }
 0x3a2   : > { %1101 = vst [vmem:[#allocation2 + $0x8] sm:$0xff] %v1083_v13  ;;  %v1905_v14 = vpop.f32.mrb[4].mxu1  ;;  %1942 = vmatpush3.bf16.msra.mxu1 (%p1116_p11), %v2153_v6 }
 0x3a3   : > { %v1044_v15 = vadd.f32 %v1905_v14, %v1690_v1  ;;  %v1035_v16 = vpop.f32.mrb[5].mxu1  ;;  %1943 = vmatprep.subr.bf16.mxu1 (%p1116_p11), %v2417_v53 }
 0x3a4   : > { %v1036_v17 = vadd.f32 %v1690_v1, %v1035_v16  ;;  %v1906_v18 = vpop.f32.mrb[6].mxu1 }
 0x3a5   : > { %v1088_v19 = vmax.f32 %v1044_v15, 0.0  ;;  %v1047_v20 = vadd.f32 %v1906_v18, %v1690_v1  ;;  %v1038_v21 = vpop.f32.mrb[7].mxu1  ;;  %v2155_v15 = vld [vmem:[#allocation12 + $0x28] sm:$0xff] (%p1116_p11)   ;;  %v1121_v18 = vld [vmem:[%s2836_s6] sm:$0xf] (%p1116_p11) }
 0x3a6   : > { %v1086_v22 = vmax.f32 %v1036_v17, 0.0  ;;  %v1039_v23 = vadd.f32 %v1690_v1, %v1038_v21  ;;  %v1124_v52 = vld [vmem:[#allocation2 + $0x10] sm:$0xff] (%p1116_p11)  ;;  %1944 = vmatpush3.bf16.msra.mxu1 (%p1116_p11), %v2154_v10  ;;  %v2159_v21 = vld [vmem:[#allocation12 + $0x48] sm:$0xff] (%p1116_p11)  }
 0x3a7   : > { %1106 = vst [vmem:[#allocation2 + $0x30] sm:$0xff] %v1088_v19  ;;  %v1089_v24 = vmax.f32 %v1047_v20, 0.0  ;;  %v1122_v50 = vld [vmem:[#allocation2] sm:$0xff] (%p1116_p11)  ;;  %1945 = vmatprep.subr.bf16.mxu1 (%p1116_p11), %v2417_v53  ;;  %v2156_v17 = vld [vmem:[#allocation12 + $0x30] sm:$0xff] (%p1116_p11)   ;;  %v2157_v19 = vld [vmem:[#allocation12 + $0x38] sm:$0xff] (%p1116_p11)  }
 0x3a8   : > { %1104 = vst [vmem:[#allocation2 + $0x20] sm:$0xff] %v1086_v22  ;;  %v1087_v25 = vmax.f32 %v1039_v23, 0.0  ;;  %v1125_v55 = vld [vmem:[#allocation2 + $0x18] sm:$0xff] (%p1116_p11)  ;;  %v2158_v20 = vld [vmem:[#allocation12 + $0x40] sm:$0xff] (%p1116_p11)   ;;  %v2160_v22 = vld [vmem:[#allocation12 + $0x50] sm:$0xff] (%p1116_p11)  }
 0x3a9   : > { %1107 = vst [vmem:[#allocation2 + $0x38] sm:$0xff] %v1089_v24  ;;  %v1123_v51 = vld [vmem:[#allocation2 + $0x8] sm:$0xff] (%p1116_p11)  ;;  %v1139_v56 = vpack.c.bf16 (%p1116_p11), %v1125_v55, %v1124_v52  ;;  %v2161_v23 = vld [vmem:[#allocation12 + $0x58] sm:$0xff] (%p1116_p11)   ;;  %v2162_v24 = vld [vmem:[#allocation12 + $0x60] sm:$0xff] (%p1116_p11)  }
 0x3aa   : > { %1105 = vst [vmem:[#allocation2 + $0x28] sm:$0xff] %v1087_v25  ;;  %v1909_v26 = vpop.f32.mrb[8].mxu1  ;;  %v1138_v54 = vpack.c.bf16 (%p1116_p11), %v1123_v51, %v1122_v50  ;;  %1946 = vmatpush3.bf16.msra.mxu1 (%p1116_p11), %v2155_v15  ;;  %v2163_v25 = vld [vmem:[#allocation12 + $0x68] sm:$0xff] (%p1116_p11)  }
 0x3ab   : > { %v1060_v27 = vadd.f32 %v1909_v26, %v1690_v1  ;;  %v1051_v28 = vpop.f32.mrb[9].mxu1  ;;  %1947 = vmatprep.subr.bf16.mxu1 (%p1116_p11), %v2417_v53 }
 0x3ac   : > { %v1052_v29 = vadd.f32 %v1690_v1, %v1051_v28  ;;  %v1910_v30 = vpop.f32.mrb[10].mxu1  ;;  %1916 = vmatpush3.bf16.msra.mxu0 (%p1116_p11), %v1138_v54 }
 0x3ad   : > { %v1092_v31 = vmax.f32 %v1060_v27, 0.0  ;;  %v1063_v32 = vadd.f32 %v1910_v30, %v1690_v1  ;;  %v1054_v33 = vpop.f32.mrb[11].mxu1  ;;  %1917 = vmatprep.subr.bf16.mxu0 (%p1116_p11), %v2417_v53 }
 0x3ae   : > { %v1090_v34 = vmax.f32 %v1052_v29, 0.0  ;;  %v1055_v35 = vadd.f32 %v1690_v1, %v1054_v33  ;;  %v1128_v59 = vld [vmem:[#allocation2 + $0x30] sm:$0xff] (%p1116_p11)  ;;  %1948 = vmatpush3.bf16.msra.mxu1 (%p1116_p11), %v2156_v17  ;;  %v2166_v33 = vld [vmem:[#allocation12 + $0x80] sm:$0xff] (%p1116_p11)  }
 0x3af   : > { %1110 = vst [vmem:[#allocation2 + $0x50] sm:$0xff] %v1092_v31  ;;  %v1093_v36 = vmax.f32 %v1063_v32, 0.0  ;;  %v1126_v57 = vld [vmem:[#allocation2 + $0x20] sm:$0xff] (%p1116_p11)  ;;  %1949 = vmatprep.subr.bf16.mxu1 (%p1116_p11), %v2417_v53  ;;  %v2164_v31 = vld [vmem:[#allocation12 + $0x70] sm:$0xff] (%p1116_p11)   ;;  %v2165_v32 = vld [vmem:[#allocation12 + $0x78] sm:$0xff] (%p1116_p11)  }
 0x3b0   : > { %1108 = vst [vmem:[#allocation2 + $0x40] sm:$0xff] %v1090_v34  ;;  %v1091_v37 = vmax.f32 %v1055_v35, 0.0  ;;  %1918 = vmatpush3.bf16.msra.mxu0 (%p1116_p11), %v1139_v56  ;;  %v1129_v62 = vld [vmem:[#allocation2 + $0x38] sm:$0xff] (%p1116_p11)  ;;  %v2167_v34 = vld [vmem:[#allocation12 + $0x88] sm:$0xff] (%p1116_p11)   ;;  %v2168_v35 = vld [vmem:[#allocation12 + $0x90] sm:$0xff] (%p1116_p11)  }
 0x3b1   : > { %1111 = vst [vmem:[#allocation2 + $0x58] sm:$0xff] %v1093_v36  ;;  %v1127_v58 = vld [vmem:[#allocation2 + $0x28] sm:$0xff] (%p1116_p11)  ;;  %1919 = vmatprep.subr.bf16.mxu0 (%p1116_p11), %v2417_v53  ;;  %v2169_v36 = vld [vmem:[#allocation12 + $0x98] sm:$0xff] (%p1116_p11)  }
 0x3b2   : > { %1109 = vst [vmem:[#allocation2 + $0x48] sm:$0xff] %v1091_v37  ;;  %v1913_v38 = vpop.f32.mrb[12].mxu1  ;;  %v1140_v61 = vpack.c.bf16 (%p1116_p11), %v1127_v58, %v1126_v57  ;;  %1950 = vmatpush3.bf16.msra.mxu1 (%p1116_p11), %v2157_v19  ;;  %v2170_v37 = vld [vmem:[#allocation12 + $0xa0] sm:$0xff] (%p1116_p11)  }
 0x3b3   : > { %v1076_v39 = vadd.f32 %v1913_v38, %v1690_v1  ;;  %v1067_v40 = vpop.f32.mrb[13].mxu1  ;;  %1975 = vmatprep.subr.bf16.mxu1 (%p1116_p11), %v2417_v53  ;;  %v2171_v38 = vld [vmem:[#allocation12 + $0xa8] sm:$0xff] (%p1116_p11)   ;;  %v1720_v58 = vld [vmem:[%s2862_s1 + $0x2] ss:$0 sm:$0xff] (%p1116_p11) }
 0x3b4   : > { %v1068_v41 = vadd.f32 %v1690_v1, %v1067_v40  ;;  %v1914_v42 = vpop.f32.mrb[14].mxu1  ;;  %1120 = sbr.rel (!%p1116_p11) target bundleno = 1836 (0x72c), region = 88  ;;  %1920 = vmatpush3.bf16.msra.mxu0 (%p1116_p11), %v1140_v61 }
 0x3b5   : > { %v1096_v43 = vmax.f32 %v1076_v39, 0.0  ;;  %v1079_v44 = vadd.f32 %v1914_v42, %v1690_v1  ;;  %v1070_v45 = vpop.f32.mrb[15].mxu1  ;;  %1921 = vmatprep.subr.bf16.mxu0 (%p1116_p11), %v2417_v53  ;;  %v1700_v39 = vld [vmem:[%s2862_s1] ss:$0 sm:$0xff] (%p1116_p11) }
 0x3b6   : > { %v1094_v46 = vmax.f32 %v1068_v41, 0.0  ;;  %v1071_v47 = vadd.f32 %v1690_v1, %v1070_v45  ;;  %v1141_v1 = vpack.c.bf16 (%p1116_p11), %v1129_v62, %v1128_v59  ;;  %v1132_v4 = vld [vmem:[#allocation2 + $0x50] sm:$0xff] (%p1116_p11) }
 0x3b7   : > { %1114 = vst [vmem:[#allocation2 + $0x70] sm:$0xff] %v1096_v43  ;;  %v1097_v48 = vmax.f32 %v1079_v44, 0.0  ;;  %v1130_v0 = vld [vmem:[#allocation2 + $0x40] sm:$0xff] (%p1116_p11) }
 0x3b8   : > { %1112 = vst [vmem:[#allocation2 + $0x60] sm:$0xff] %v1094_v46  ;;  %v1095_v49 = vmax.f32 %v1071_v47, 0.0  ;;  %v1133_v5 = vld [vmem:[#allocation2 + $0x58] sm:$0xff] (%p1116_p11)  ;;  %1922 = vmatpush3.bf16.msra.mxu0 (%p1116_p11), %v1141_v1  ;;  %v2172_v47 = vld [vmem:[#allocation12 + $0xb0] sm:$0xff] (%p1116_p11)  }
 0x3b9   : > { %1115 = vst [vmem:[#allocation2 + $0x78] sm:$0xff] %v1097_v48  ;;  %v1131_v2 = vld [vmem:[#allocation2 + $0x48] sm:$0xff] (%p1116_p11)  ;;  %1923 = vmatprep.subr.bf16.mxu0 (%p1116_p11), %v2417_v53  ;;  %v1143_v11 = vpack.c.bf16 (%p1116_p11), %v1133_v5, %v1132_v4  ;;  %v2173_v48 = vld [vmem:[#allocation12 + $0xb8] sm:$0xff] (%p1116_p11)  }
 0x3ba   : > { %1113 = vst [vmem:[#allocation2 + $0x68] sm:$0xff] %v1095_v49  ;;  %v1142_v7 = vpack.c.bf16 (%p1116_p11), %v1131_v2, %v1130_v0  ;;  %v1710_v49 = vld [vmem:[%s2862_s1 + $0x1] ss:$0 sm:$0xff] (%p1116_p11) }
 0x3bc   : > { %1924 = vmatpush3.bf16.msra.mxu0 %v1142_v7 }
 0x3bd   : > { %1925 = vmatprep.subr.bf16.mxu0 %v2417_v53 }
 0x3be   : > { %v1136_v13 = vld [vmem:[#allocation2 + $0x70] sm:$0xff] }
 0x3bf   : > { %v1134_v8 = vld [vmem:[#allocation2 + $0x60] sm:$0xff] }
 0x3c0   : > { %1926 = vmatpush3.bf16.msra.mxu0 %v1143_v11  ;;  %v1137_v14 = vld [vmem:[#allocation2 + $0x78] sm:$0xff] }
 0x3c1   : > { %v1135_v9 = vld [vmem:[#allocation2 + $0x68] sm:$0xff]  ;;  %1927 = vmatprep.subr.bf16.mxu0 %v2417_v53  ;;  %v1145_v16 = vpack.c.bf16 %v1137_v14, %v1136_v13 }
 0x3c2   : > { %v1144_v12 = vpack.c.bf16 %v1135_v9, %v1134_v8 }
 0x3c4   : > { %1928 = vmatpush3.bf16.msra.mxu0 %v1144_v12 }
 0x3c5   : > { %1929 = vmatprep.subr.bf16.mxu0 %v2417_v53 }
 0x3c8   : > { %1930 = vmatpush3.bf16.msra.mxu0 %v1145_v16 }
 0x3c9   : > { %1955 = vmatprep.subr.bf16.mxu0 %v2417_v53 }
 0x3cb   : > { %1932 = vmatmul.mubr.bf16.vlgmr.msra.gmra.mrb[0].mxu0 %v1121_v18 }
 0x3cc   : > { %1971 = vmatprep.mubr.msk.bf16.mxu0 %vm2418_vm0, %v2417_v53  ;;  %1956 = vmatpush3.bf16.msra.mxu0 %v2158_v20 }
 0x3cd   : > { %1957 = vmatprep.subr.bf16.mxu0 %v2417_v53 }
 0x3d0   : > { %1958 = vmatpush3.bf16.msra.mxu0 %v2159_v21 }
 0x3d1   : > { %1959 = vmatprep.subr.bf16.mxu0 %v2417_v53 }
 0x3d4   : > { %1960 = vmatpush3.bf16.msra.mxu0 %v2160_v22 }
 0x3d5   : > { %1961 = vmatprep.subr.bf16.mxu0 %v2417_v53 }
 0x3d8   : > { %1962 = vmatpush3.bf16.msra.mxu0 %v2161_v23 }
 0x3d9   : > { %1963 = vmatprep.subr.bf16.mxu0 %v2417_v53 }
 0x3dc   : > { %1964 = vmatpush3.bf16.msra.mxu0 %v2162_v24 }
 0x3dd   : > { %1965 = vmatprep.subr.bf16.mxu0 %v2417_v53 }
 0x3e0   : > { %1966 = vmatpush3.bf16.msra.mxu0 %v2163_v25 }
 0x3e1   : > { %1967 = vmatprep.subr.bf16.mxu0 %v2417_v53 }
 0x3e4   : > { %1968 = vmatpush3.bf16.msra.mxu0 %v2164_v31 }
 0x3e5   : > { %1969 = vmatprep.subr.bf16.mxu0 %v2417_v53 }
 0x3e8   : > { %1970 = vmatpush3.bf16.msra.mxu0 %v2165_v32 }
 0x49e   : > { %v1180_v26 = vpop.f32.mrb[0].mxu0 }
 0x49f   : > { %v1186_v27 = vpack.c.bf16 %v1180_v26, %v1180_v26  ;;  %v1933_v28 = vpop.f32.mrb[1].mxu0 }
 0x4a0   : > { %v1183_v29 = vpop.f32.mrb[2].mxu0 }
 0x4a1   : > { %v1934_v30 = vpop.f32.mrb[3].mxu0  ;;  %1952 = vmatmul.mubr.bf16.vlgmr.msra.gmra.mrb[0].mxu1 %v1186_v27 }
 0x4a2   : > { %1991 = vmatprep.mubr.msk.bf16.mxu1 %vm2418_vm0, %v2417_v53  ;;  %1976 = vmatpush3.bf16.msra.mxu1 %v2166_v33 }
 0x4a3   : > { %1977 = vmatprep.subr.bf16.mxu1 %v2417_v53 }
 0x4a6   : > { %1978 = vmatpush3.bf16.msra.mxu1 %v2167_v34 }
 0x4a7   : > { %1979 = vmatprep.subr.bf16.mxu1 %v2417_v53 }
 0x4aa   : > { %1980 = vmatpush3.bf16.msra.mxu1 %v2168_v35 }
 0x4ab   : > { %1981 = vmatprep.subr.bf16.mxu1 %v2417_v53 }
 0x4ae   : > { %1982 = vmatpush3.bf16.msra.mxu1 %v2169_v36 }
 0x4af   : > { %1983 = vmatprep.subr.bf16.mxu1 %v2417_v53 }
 0x4b2   : > { %1984 = vmatpush3.bf16.msra.mxu1 %v2170_v37 }
 0x4b3   : > { %1985 = vmatprep.subr.bf16.mxu1 %v2417_v53 }
 0x4b6   : > { %1986 = vmatpush3.bf16.msra.mxu1 %v2171_v38 }
 0x4b7   : > { %1987 = vmatprep.subr.bf16.mxu1 %v2417_v53 }
 0x4ba   : > { %1988 = vmatpush3.bf16.msra.mxu1 %v2172_v47 }
 0x4bb   : > { %1989 = vmatprep.subr.bf16.mxu1 %v2417_v53 }
 0x4be   : > { %1990 = vmatpush3.bf16.msra.mxu1 %v2173_v48 }
 0x574   : > { %v1292_v40 = vpop.f32.mrb[0].mxu1 }
 0x575   : > { %v1293_v41 = vadd.f32 %v1700_v39, %v1292_v40  ;;  %v1953_v42 = vpop.f32.mrb[1].mxu1 }
 0x576   : > { %v1295_v43 = vpop.f32.mrb[2].mxu1 }
 0x577   : > { %v1298_v44 = vmax.f32 %v1293_v41, 0.0  ;;  %v1954_v45 = vpop.f32.mrb[3].mxu1 }
 0x579   : > { %v1299_v46 = vpack.c.bf16 %v1298_v44, %v1298_v44 }
 0x57b   : > { %1972 = vmatmul.mubr.bf16.vlgmr.msra.gmra.mrb[4].mxu0 %v1299_v46 }
 0x64e   : > { %v1407_v50 = vpop.f32.mrb[4].mxu0 }
 0x64f   : > { %v1408_v51 = vadd.f32 %v1710_v49, %v1407_v50  ;;  %v1973_v52 = vpop.f32.mrb[5].mxu0 }
 0x650   : > { %v1410_v54 = vpop.f32.mrb[6].mxu0 }
 0x651   : > { %v1413_v55 = vmax.f32 %v1408_v51, 0.0  ;;  %v1974_v56 = vpop.f32.mrb[7].mxu0 }
 0x653   : > { %v1414_v57 = vpack.c.bf16 %v1413_v55, %v1413_v55 }
 0x655   : > { %1992 = vmatmul.mubr.bf16.vlgmr.msra.gmra.mrb[4].mxu1 %v1414_v57 }
 0x728   : > { %v1522_v59 = vpop.f32.mrb[4].mxu1 }
 0x729   : > { %v1523_v53 = vadd.f32 %v1720_v58, %v1522_v59  ;;  %v1993_v60 = vpop.f32.mrb[5].mxu1 }
 0x72a   : > { %v1525_v61 = vpop.f32.mrb[6].mxu1 }
 0x72b   : > { %1528 = vst [vmem:[#allocation13] sm:$0xff] %v1523_v53  ;;  %v1994_v62 = vpop.f32.mrb[7].mxu1 }
 0x72c PF: > { %p2059_p13 = scmp.eq.s32.totalorder %s2499_s15, 1  ;;  %s2419_s9 = smov [#allocation13]  }
 0x72d   : > { %s1536_s28 = sshll.u32 %s2419_s9, 4  ;;  %s1537_s28 = int_to_ptr.vmem [resolvable:$true] %s1536_s28 }
 0x72e   : > { %s2316_s26 = scalar_lea.vmem %s1537_s28, 128  ;;  %p2323_p0 = scmp.lt.s32.totalorder %s1537_s28, %s1537_s28 }
 0x72f   : > { %p2317_p2 = scmp.ne.s32.totalorder %s1537_s28, %s2316_s26  ;;  %p2324_p6 = scmp.lt.s32.totalorder %s2316_s26, %s2316_s26 }
 0x731   : > { %p2318_p3 = pnand %p2317_p2, %p2059_p13  ;;  %p2325_p9 = por %p2324_p6, %p2323_p0 }
 0x733   : > { %p2319_p12 = pneg %p2318_p3 }
 0x735   : > { %p2326_p1 = pnand %p2325_p9, %p2319_p12 }
 0x737   : > { %2329 = shalt.err (!%p2326_p1)
}
 0x738   : > { %s2863_s27 = sld [smem:[#allocation21_spill]] }
 0x73e   : > { %s2330_s8 = scalar_lea.hbm %s2863_s27, 128 }
 0x73f   : > { %p2331_p7 = scmp.ne.s32.totalorder %s2863_s27, %s2330_s8  ;;  %p2336_p8 = scmp.lt.u32.totalorder %s2330_s8, %s2863_s27 }
 0x741   : > { %p2332_p4 = pnand %p2331_p7, %p2059_p13 }
 0x743   : > { %p2333_p5 = pneg %p2332_p4 }
 0x745   : > { %p2338_p10 = pnand %p2336_p8, %p2333_p5 }
 0x747   : > { %2341 = shalt.err (!%p2338_p10)
}
 0x748   : > { %2030 = dma.vmem_to_hbm [thread:$0]  (%p2059_p13), %s1537_s28, 128, %s2863_s27, [#allocation6]  }
 0x749   : > { %2383 = dma.done.wait (%p2059_p13), [#allocation6], 128  }
 0x74a   : > { %2385 = vsyncadd (%p2059_p13), [#allocation6], 4294967168 }
 0x74b PF: > { %s25_s14 = sadd.s32 1, %s2408_s14   ;;  %s2864_s30 = smov %s2392_s10 }
 0x74c   : > { %p22_p11 = scmp.ge.s32.totalorder %s25_s14, 4   ;;  %s2865_s10 = smov %s2396_s11 }
 0x74d   : > { %s2866_s11 = smov %s2641_s19  ;;  %s2867_s12 = smov %s2404_s13 }
 0x74e   : > { %s2868_s13 = smov %s2870_s20  ;;  %24 = sbr.rel (!%p22_p11) target bundleno = 11 (0xb), region = 131 }
 0x755   :  { %1549 = vsyncpa [#allocation5], 1 }
 0x756   :  { %1551 = vsyncpa [#allocation5 + $0x1], 1 }
 0x757   :  { %1552 = vsyncpa [#allocation8], 1 }
 0x758   :  { %1553 = vsyncpa [#allocation11], 1 }
 0x759   :  { %1555 = vsyncpa [#allocation11 + $0x1], 1 }
 0x75a   :  { %1556 = vsyncpa [#allocation6], 1 }
 0x75b   :  { %1558 = vsyncpa [#allocation6 + $0x1], 1 }

</bundles_post_ra>
